<compile_context>
chip_gen: v5e
topology: v5e:2x2
jax: 0.10.0
libtpu: 0.0.40
codegen_flags: <defaults>
</compile_context>

<pallas_src>
import functools

import jax
import jax.numpy as jnp
import numpy as np
from jax.experimental import pallas as pl
from jax.experimental.pallas import tpu as pltpu

LEAKY_SLOPE = 0.01            # nn.LeakyReLU default negative_slope
COMPUTE_DTYPE = jnp.bfloat16  # activations / conv weights (f32 accumulation everywhere)
VMEM_LIMIT_BYTES = 48 * 1024 * 1024  # leaves headroom on v7x's 64 MiB VMEM


# ----------------------------- Pallas kernels ------------------------------ #

def _load_dy_taps(src_ref, row0, width, thw):
    """Gather the 3 dy-shifted row windows from a (1, (H+2)*W, 3C) resident block
    and concatenate along lanes -> (TILE_HW, 9C)."""
    taps = []
    for dy in range(3):
        start = (row0 + dy) * width
        if width % 8 == 0:
            start = pl.multiple_of(start, 8)       # sublane-aligned dynamic slice
        taps.append(src_ref[0, pl.ds(start, thw), :])
    return jnp.concatenate(taps, axis=-1)


def _stage1_kernel(x_ref, w_ref, b_ref, leak_ref, o_ref, *, width):
    """Fused conv1 + skip conv (weights concatenated along Cout) + LeakyReLU on the
    conv1 half (leak vector is 0.01 for conv1 columns, 1.0 for skip columns).

    x_ref:    (1, (H+2)*W, 3*Cin)   dx-preshifted, VMEM-resident per batch element
    w_ref:    (9*Cin, 2*Cup)        b_ref/leak_ref: (1, 2*Cup)
    o_ref:    (1, TILE_H*W, 2*Cup)
    """
    thw = o_ref.shape[1]
    row0 = pl.program_id(1) * (thw // width)
    taps = _load_dy_taps(x_ref, row0, width, thw)                    # (THW, 9*Cin)
    acc = jnp.dot(taps, w_ref[...], preferred_element_type=jnp.float32) + b_ref[...]
    y = jnp.where(acc >= 0, acc, acc * leak_ref[...])                # masked LeakyReLU
    o_ref[0] = y.astype(o_ref.dtype)


def _stage2_kernel(y_ref, s_ref, w_ref, b_ref, gT_ref, beta_ref, o_ref, *, width):
    """Sub-pixel conv2 (conv2 folded through PixelShuffle) + inverse GDN + residual add.

    y_ref:    (1, (H+2)*W, 3*Cup)   dx-preshifted stage-1 activations (resident)
    s_ref:    (1, TILE_H*W, Cup)    skip-branch activations (per-pixel)
    w_ref:    (9*Cup, Cup)          b_ref/beta_ref: (1, Cup)   gT_ref: (Cup, Cup)
    o_ref:    (1, TILE_H*W, Cup)
    """
    thw = o_ref.shape[1]
    row0 = pl.program_id(1) * (thw // width)
    taps = _load_dy_taps(y_ref, row0, width, thw)                    # (THW, 9*Cup)
    z = jnp.dot(taps, w_ref[...], preferred_element_type=jnp.float32) + b_ref[...]
    norm = jnp.dot(z * z, gT_ref[...], preferred_element_type=jnp.float32) + beta_ref[...]
    g = z * jnp.sqrt(norm)                                           # inverse GDN (EUP sqrt)
    o_ref[0] = (s_ref[0].astype(jnp.float32) + g).astype(o_ref.dtype)


# --------------------------- pallas_call wrappers --------------------------- #

def _compiler_params():
    return pltpu.CompilerParams(
        dimension_semantics=("parallel", "parallel"),
        vmem_limit_bytes=VMEM_LIMIT_BYTES,
    )


def _pick_row_tile(h, w, max_positions=2048):
    """Largest divisor of h with tile_h*w <= max_positions, (tile_h*w) % 8 == 0,
    preferring >=2 tiles; falls back to the full height (always BlockSpec-legal)."""
    divs = [d for d in range(1, h + 1) if h % d == 0]
    ok = [d for d in divs if d * w <= max_positions and (d * w) % 8 == 0]
    if not ok:
        return h
    multi = [d for d in ok if h // d >= 2]
    return max(multi) if multi else max(ok)


def _stage1(x_pre, wk, bias, leak, *, height, width, row_tile):
    n, hp_w, c3 = x_pre.shape
    k, c_out = wk.shape
    hw, thw = height * width, row_tile * width
    return pl.pallas_call(
        functools.partial(_stage1_kernel, width=width),
        out_shape=jax.ShapeDtypeStruct((n, hw, c_out), COMPUTE_DTYPE),
        grid=(n, height // row_tile),
        in_specs=[
            pl.BlockSpec((1, hp_w, c3), lambda b, r: (b, 0, 0)),   # resident per batch elem
            pl.BlockSpec((k, c_out), lambda b, r: (0, 0)),
            pl.BlockSpec((1, c_out), lambda b, r: (0, 0)),
            pl.BlockSpec((1, c_out), lambda b, r: (0, 0)),
        ],
        out_specs=pl.BlockSpec((1, thw, c_out), lambda b, r: (b, r, 0)),
        compiler_params=_compiler_params(),
    )(x_pre, wk, bias, leak)


def _stage2(y_pre, skip, wk, bias, gT, beta, *, height, width, row_tile):
    n, hp_w, c3 = y_pre.shape
    k, c_out = wk.shape
    hw, thw = height * width, row_tile * width
    return pl.pallas_call(
        functools.partial(_stage2_kernel, width=width),
        out_shape=jax.ShapeDtypeStruct((n, hw, c_out), jnp.float32),
        grid=(n, height // row_tile),
        in_specs=[
            pl.BlockSpec((1, hp_w, c3), lambda b, r: (b, 0, 0)),   # resident per batch elem
            pl.BlockSpec((1, thw, c_out), lambda b, r: (b, r, 0)),
            pl.BlockSpec((k, c_out), lambda b, r: (0, 0)),
            pl.BlockSpec((1, c_out), lambda b, r: (0, 0)),
            pl.BlockSpec((c_out, c_out), lambda b, r: (0, 0)),
            pl.BlockSpec((1, c_out), lambda b, r: (0, 0)),
        ],
        out_specs=pl.BlockSpec((1, thw, c_out), lambda b, r: (b, r, 0)),
        compiler_params=_compiler_params(),
    )(y_pre, skip, wk, bias, gT, beta)


# ------------------------------- JAX glue ---------------------------------- #

def _dx_preshift(x):
    """NHWC (N,H,W,C) -> (N, (H+2)*W, 3C): pad by 1, concat the three dx-shifted
    width-windows along channels, flatten rows.  dy shifts are done in-kernel."""
    n, h, w, c = x.shape
    xp = jnp.pad(x, ((0, 0), (1, 1), (1, 1), (0, 0)))
    shifted = jnp.concatenate([xp[:, :, dx:dx + w, :] for dx in range(3)], axis=-1)
    return shifted.reshape(n, (h + 2) * w, 3 * c)


def _pixel_shuffle_nhwc(x, r):
    """NHWC PixelShuffle: (N,H,W,C*r*r) -> (N,H*r,W*r,C), torch semantics."""
    n, h, w, cr2 = x.shape
    c = cr2 // (r * r)
    x = x.reshape(n, h, w, c, r, r)
    x = jnp.transpose(x, (0, 1, 4, 2, 5, 3))
    return x.reshape(n, h * r, w * r, c)


def _conv_after_pixel_shuffle_weight(w2, r):
    """Fold a 3x3 conv applied AFTER PixelShuffle(r) into an equivalent 3x3 conv on the
    un-shuffled (Cout*r^2-channel) tensor:  conv2 o PS == PS o conv2_eff.
    w2: (3,3,Cout,Cout) (ky,kx,ci,co) -> (3,3,Cup,Cup)."""
    cout = w2.shape[-1]
    r2 = r * r
    w_eff = jnp.zeros((3, 3, cout, r2, cout, r2), w2.dtype)
    for i in range(r):
        for j in range(r):
            for dy in range(3):
                for dx in range(3):
                    a, b = i + dy - 1, j + dx - 1
                    dh, ii = a // r + 1, a % r
                    dw, jj = b // r + 1, b % r
                    w_eff = w_eff.at[dh, dw, :, ii * r + jj, :, i * r + j].set(w2[dy, dx])
    return w_eff.reshape(3, 3, cout * r2, cout * r2)


def _gdn_unshuffled(gamma, beta, r):
    """iGDN applied after PixelShuffle == block-diagonal iGDN in the un-shuffled domain."""
    cout = gamma.shape[0]
    r2 = r * r
    g = jnp.zeros((cout, r2, cout, r2), gamma.dtype)
    for s in range(r2):
        g = g.at[:, s, :, s].set(gamma)
    return g.reshape(cout * r2, cout * r2), jnp.repeat(beta, r2)


# --------------------------- parameters & forward --------------------------- #

def init_params(key, channel_in, channel_out, upscale):
    k = jax.random.split(key, 8)
    cup = channel_out * upscale ** 2
    s1 = 1.0 / np.sqrt(channel_in * 9)
    s2 = 1.0 / np.sqrt(channel_out * 9)
    # non-negative, NON-symmetric gamma so a transposed-gamma bug would be caught
    gamma = 0.1 * jnp.eye(channel_out) + 0.02 * jax.random.uniform(k[6], (channel_out, channel_out))
    beta = 1.0 + 0.1 * jax.random.uniform(k[7], (channel_out,))
    return dict(
        w1=jax.random.normal(k[0], (3, 3, channel_in, cup), jnp.float32) * s1,   # (ky,kx,ci,co)
        b1=jax.random.normal(k[1], (cup,), jnp.float32) * 0.01,
        ws=jax.random.normal(k[2], (3, 3, channel_in, cup), jnp.float32) * s1,
        bs=jax.random.normal(k[3], (cup,), jnp.float32) * 0.01,
        w2=jax.random.normal(k[4], (3, 3, channel_out, channel_out), jnp.float32) * s2,
        b2=jax.random.normal(k[5], (channel_out,), jnp.float32) * 0.01,
        gamma=gamma.astype(jnp.float32),
        beta=beta.astype(jnp.float32),
    )


def residual_block_upsample(x_nchw, params, upscale=2):
    x = jnp.transpose(x_nchw, (0, 2, 3, 1)).astype(jnp.float32)      # NCHW -> NHWC
    n, h, w, cin = x.shape
    cout = params['w2'].shape[-1]
    r = upscale
    cup = cout * r * r
    row_tile = _pick_row_tile(h, w)

    # ---- stage 1: conv1 + LeakyReLU fused with skip conv (shared LHS, one matmul) ----
    wk1 = jnp.concatenate([params['w1'], params['ws']], axis=-1).reshape(9 * cin, 2 * cup)
    wk1 = wk1.astype(COMPUTE_DTYPE)
    bias1 = jnp.concatenate([params['b1'], params['bs']]).reshape(1, 2 * cup).astype(jnp.float32)
    leak = jnp.concatenate([jnp.full((cup,), LEAKY_SLOPE, jnp.float32),
                            jnp.ones((cup,), jnp.float32)]).reshape(1, 2 * cup)
    x_pre = _dx_preshift(x.astype(COMPUTE_DTYPE))                    # (n, (h+2)*w, 3*cin)
    # TODO(synk): for very large images, replace the VMEM-resident padded input block
    # with a manual halo DMA (pl.ANY + make_async_copy) so the input is row-tiled too.
    a = _stage1(x_pre, wk1, bias1, leak, height=h, width=w, row_tile=row_tile)

    y_u = a[:, :, :cup].reshape(n, h, w, cup)                        # LeakyReLU(conv1(x))
    skip_u = a[:, :, cup:]                                           # skip conv output

    # ---- stage 2: conv2 folded through PixelShuffle + inverse GDN + residual add ----
    wk2 = _conv_after_pixel_shuffle_weight(params['w2'], r).reshape(9 * cup, cup)
    wk2 = wk2.astype(COMPUTE_DTYPE)
    b2_u = jnp.repeat(params['b2'], r * r).reshape(1, cup).astype(jnp.float32)
    gamma_u, beta_u = _gdn_unshuffled(params['gamma'], params['beta'], r)
    y_pre = _dx_preshift(y_u)                                        # (n, (h+2)*w, 3*cup)
    out_u = _stage2(y_pre, skip_u, wk2, b2_u,
                    gamma_u.T.astype(jnp.float32), beta_u.reshape(1, cup).astype(jnp.float32),
                    height=h, width=w, row_tile=row_tile)            # (n, h*w, cup) f32

    out = _pixel_shuffle_nhwc(out_u.reshape(n, h, w, cup), r)        # single shuffle at the end
    return jnp.transpose(out, (0, 3, 1, 2))                          # back to NCHW


# ------------------------------ pure-JAX reference -------------------------- #

def _conv3x3_ref(x, w, b):
    n, h, wd, _ = x.shape
    xp = jnp.pad(x, ((0, 0), (1, 1), (1, 1), (0, 0)))
    acc = jnp.zeros((n, h, wd, w.shape[-1]), jnp.float32)
    for ky in range(3):
        for kx in range(3):
            acc = acc + jnp.einsum('nhwc,cd->nhwd', xp[:, ky:ky + h, kx:kx + wd, :], w[ky, kx])
    return acc + b


def reference(x_nchw, params, upscale=2):
    x = jnp.transpose(x_nchw, (0, 2, 3, 1)).astype(jnp.float32)
    y = _pixel_shuffle_nhwc(_conv3x3_ref(x, params['w1'], params['b1']), upscale)
    y = jnp.where(y >= 0, y, LEAKY_SLOPE * y)
    y = _conv3x3_ref(y, params['w2'], params['b2'])
    norm = jnp.einsum('nhwc,dc->nhwd', y * y, params['gamma']) + params['beta']
    y = y * jnp.sqrt(norm)                                           # inverse GDN
    s = _pixel_shuffle_nhwc(_conv3x3_ref(x, params['ws'], params['bs']), upscale)
    return jnp.transpose(s + y, (0, 3, 1, 2))


# ----------------------------------- main ----------------------------------- #

if __name__ == "__main__":
    key = jax.random.PRNGKey(0)
    kx, kp = jax.random.split(key)
    channel_in, channel_out, upscale = 4, 4, 2
    x = jax.random.normal(kx, (2, channel_in, 16, 16), jnp.float32)
    params = init_params(kp, channel_in, channel_out, upscale)

    fwd = jax.jit(functools.partial(residual_block_upsample, upscale=upscale))
    out = jax.block_until_ready(fwd(x, params))
    ref = jax.block_until_ready(reference(x, params, upscale))

    assert out.shape == (2, channel_out, 16 * upscale, 16 * upscale)
    np.testing.assert_allclose(np.asarray(out), np.asarray(ref), rtol=5e-2, atol=5e-2)
    print("KERNEL_OK")
</pallas_src>

<mosaic_0001>
module attributes {stable_mosaic.version = 11 : i64} {
  func.func @_stage1_kernel(%arg0: i32, %arg1: i32, %arg2: memref<1x288x12xbf16, #tpu.memory_space<vmem>>, %arg3: memref<36x32xbf16, #tpu.memory_space<vmem>>, %arg4: memref<1x32xf32, #tpu.memory_space<vmem>>, %arg5: memref<1x32xf32, #tpu.memory_space<vmem>>, %arg6: memref<1x128x32xbf16, #tpu.memory_space<vmem>>) attributes {dimension_semantics = [#tpu.dimension_semantics<parallel>, #tpu.dimension_semantics<parallel>], iteration_bounds = array<i64: 2, 2>, scalar_prefetch = 0 : i64, scratch_operands = 0 : i64, tpu.core_type = #tpu.core_type<tc>, window_params = [{transform_indices = @transform_0, window_bounds = array<i64: 1, 288, 12>}, {pipeline_mode = #tpu.pipeline_mode<synchronous>, transform_indices = @transform_1, window_bounds = array<i64: 36, 32>}, {pipeline_mode = #tpu.pipeline_mode<synchronous>, transform_indices = @transform_2, window_bounds = array<i64: 1, 32>}, {pipeline_mode = #tpu.pipeline_mode<synchronous>, transform_indices = @transform_3, window_bounds = array<i64: 1, 32>}, {transform_indices = @transform_4, window_bounds = array<i64: 1, 128, 32>}]} {
    %c8_i32 = arith.constant 8 : i32
    %0 = arith.muli %arg1, %c8_i32 : i32
    %c0_i32 = arith.constant 0 : i32
    %1 = arith.addi %0, %c0_i32 : i32
    %c16_i32 = arith.constant 16 : i32
    %2 = arith.muli %1, %c16_i32 : i32
    %3 = tpu.assume_multiple %2, 8 : i32
    %c0 = arith.constant 0 : index
    %4 = arith.index_cast %3 : i32 to index
    %c0_0 = arith.constant 0 : index
    %5 = vector.load %arg2[%c0, %4, %c0_0] : memref<1x288x12xbf16, #tpu.memory_space<vmem>>, vector<1x128x12xbf16>
    %6 = vector.shape_cast %5 : vector<1x128x12xbf16> to vector<128x12xbf16>
    %c1_i32 = arith.constant 1 : i32
    %7 = arith.addi %0, %c1_i32 : i32
    %c16_i32_1 = arith.constant 16 : i32
    %8 = arith.muli %7, %c16_i32_1 : i32
    %9 = tpu.assume_multiple %8, 8 : i32
    %c0_2 = arith.constant 0 : index
    %10 = arith.index_cast %9 : i32 to index
    %c0_3 = arith.constant 0 : index
    %11 = vector.load %arg2[%c0_2, %10, %c0_3] : memref<1x288x12xbf16, #tpu.memory_space<vmem>>, vector<1x128x12xbf16>
    %12 = vector.shape_cast %11 : vector<1x128x12xbf16> to vector<128x12xbf16>
    %c2_i32 = arith.constant 2 : i32
    %13 = arith.addi %0, %c2_i32 : i32
    %c16_i32_4 = arith.constant 16 : i32
    %14 = arith.muli %13, %c16_i32_4 : i32
    %15 = tpu.assume_multiple %14, 8 : i32
    %c0_5 = arith.constant 0 : index
    %16 = arith.index_cast %15 : i32 to index
    %c0_6 = arith.constant 0 : index
    %17 = vector.load %arg2[%c0_5, %16, %c0_6] : memref<1x288x12xbf16, #tpu.memory_space<vmem>>, vector<1x128x12xbf16>
    %18 = vector.shape_cast %17 : vector<1x128x12xbf16> to vector<128x12xbf16>
    %19 = tpu.concatenate %6, %12, %18 in 1 : vector<128x12xbf16>, vector<128x12xbf16>, vector<128x12xbf16> -> vector<128x36xbf16>
    %c0_7 = arith.constant 0 : index
    %c0_8 = arith.constant 0 : index
    %20 = vector.load %arg3[%c0_7, %c0_8] : memref<36x32xbf16, #tpu.memory_space<vmem>>, vector<36x32xbf16>
    %cst = arith.constant dense<0.000000e+00> : vector<128x32xf32>
    %21 = tpu.matmul %19, %20, %cst {dimension_numbers = #tpu.dot_dimension_numbers<[1], [0], [0], [1], [0, 0, 1, 1], [], []>} : vector<128x36xbf16>, vector<36x32xbf16>, vector<128x32xf32> -> vector<128x32xf32>
    %c0_9 = arith.constant 0 : index
    %c0_10 = arith.constant 0 : index
    %22 = vector.load %arg4[%c0_9, %c0_10] : memref<1x32xf32, #tpu.memory_space<vmem>>, vector<1x32xf32>
    %23 = vector.broadcast %22 : vector<1x32xf32> to vector<128x32xf32>
    %24 = arith.addf %21, %23 : vector<128x32xf32>
    %cst_11 = arith.constant 0.000000e+00 : f32
    %25 = vector.broadcast %cst_11 : f32 to vector<128x32xf32>
    %26 = arith.cmpf oge, %24, %25 : vector<128x32xf32>
    %c0_12 = arith.constant 0 : index
    %c0_13 = arith.constant 0 : index
    %27 = vector.load %arg5[%c0_12, %c0_13] : memref<1x32xf32, #tpu.memory_space<vmem>>, vector<1x32xf32>
    %28 = vector.broadcast %27 : vector<1x32xf32> to vector<128x32xf32>
    %29 = arith.mulf %24, %28 : vector<128x32xf32>
    %30 = arith.select %26, %24, %29 : vector<128x32xi1>, vector<128x32xf32>
    %31 = arith.truncf %30 : vector<128x32xf32> to vector<128x32xbf16>
    %c0_14 = arith.constant 0 : index
    %c0_15 = arith.constant 0 : index
    %c0_16 = arith.constant 0 : index
    %32 = vector.load %arg6[%c0_14, %c0_15, %c0_16] : memref<1x128x32xbf16, #tpu.memory_space<vmem>>, vector<1x128x32xbf16>
    %33 = vector.shape_cast %32 : vector<1x128x32xbf16> to vector<128x32xbf16>
    %34 = vector.shape_cast %31 : vector<128x32xbf16> to vector<1x128x32xbf16>
    tpu.vector_store %arg6[%c0_14, %c0_15, %c0_16], %34 {strides = array<i32>} : memref<1x128x32xbf16, #tpu.memory_space<vmem>>, vector<1x128x32xbf16>,
    return
  }
  func.func @transform_0(%arg0: i32, %arg1: i32) -> (i32, i32, i32) {
    %c0_i32 = arith.constant 0 : i32
    %c0_i32_0 = arith.constant 0 : i32
    %c0_i32_1 = arith.constant 0 : i32
    return %arg0, %c0_i32, %c0_i32_0 : i32, i32, i32
  }
  func.func @transform_1(%arg0: i32, %arg1: i32) -> (i32, i32) {
    %c0_i32 = arith.constant 0 : i32
    %c0_i32_0 = arith.constant 0 : i32
    %c0_i32_1 = arith.constant 0 : i32
    return %c0_i32, %c0_i32_0 : i32, i32
  }
  func.func @transform_2(%arg0: i32, %arg1: i32) -> (i32, i32) {
    %c0_i32 = arith.constant 0 : i32
    %c0_i32_0 = arith.constant 0 : i32
    %c0_i32_1 = arith.constant 0 : i32
    return %c0_i32, %c0_i32_0 : i32, i32
  }
  func.func @transform_3(%arg0: i32, %arg1: i32) -> (i32, i32) {
    %c0_i32 = arith.constant 0 : i32
    %c0_i32_0 = arith.constant 0 : i32
    %c0_i32_1 = arith.constant 0 : i32
    return %c0_i32, %c0_i32_0 : i32, i32
  }
  func.func @transform_4(%arg0: i32, %arg1: i32) -> (i32, i32, i32) {
    %c0_i32 = arith.constant 0 : i32
    %c0_i32_0 = arith.constant 0 : i32
    return %arg0, %arg1, %c0_i32 : i32, i32, i32
  }
}

module attributes {stable_mosaic.version = 11 : i64} {
  func.func @_stage2_kernel(%arg0: i32, %arg1: i32, %arg2: memref<1x288x48xbf16, #tpu.memory_space<vmem>>, %arg3: memref<1x128x16xbf16, #tpu.memory_space<vmem>>, %arg4: memref<144x16xbf16, #tpu.memory_space<vmem>>, %arg5: memref<1x16xf32, #tpu.memory_space<vmem>>, %arg6: memref<16x16xf32, #tpu.memory_space<vmem>>, %arg7: memref<1x16xf32, #tpu.memory_space<vmem>>, %arg8: memref<1x128x16xf32, #tpu.memory_space<vmem>>) attributes {dimension_semantics = [#tpu.dimension_semantics<parallel>, #tpu.dimension_semantics<parallel>], iteration_bounds = array<i64: 2, 2>, scalar_prefetch = 0 : i64, scratch_operands = 0 : i64, tpu.core_type = #tpu.core_type<tc>, window_params = [{transform_indices = @transform_0, window_bounds = array<i64: 1, 288, 48>}, {transform_indices = @transform_1, window_bounds = array<i64: 1, 128, 16>}, {pipeline_mode = #tpu.pipeline_mode<synchronous>, transform_indices = @transform_2, window_bounds = array<i64: 144, 16>}, {pipeline_mode = #tpu.pipeline_mode<synchronous>, transform_indices = @transform_3, window_bounds = array<i64: 1, 16>}, {pipeline_mode = #tpu.pipeline_mode<synchronous>, transform_indices = @transform_4, window_bounds = array<i64: 16, 16>}, {pipeline_mode = #tpu.pipeline_mode<synchronous>, transform_indices = @transform_5, window_bounds = array<i64: 1, 16>}, {transform_indices = @transform_6, window_bounds = array<i64: 1, 128, 16>}]} {
    %c8_i32 = arith.constant 8 : i32
    %0 = arith.muli %arg1, %c8_i32 : i32
    %c0_i32 = arith.constant 0 : i32
    %1 = arith.addi %0, %c0_i32 : i32
    %c16_i32 = arith.constant 16 : i32
    %2 = arith.muli %1, %c16_i32 : i32
    %3 = tpu.assume_multiple %2, 8 : i32
    %c0 = arith.constant 0 : index
    %4 = arith.index_cast %3 : i32 to index
    %c0_0 = arith.constant 0 : index
    %5 = vector.load %arg2[%c0, %4, %c0_0] : memref<1x288x48xbf16, #tpu.memory_space<vmem>>, vector<1x128x48xbf16>
    %6 = vector.shape_cast %5 : vector<1x128x48xbf16> to vector<128x48xbf16>
    %c1_i32 = arith.constant 1 : i32
    %7 = arith.addi %0, %c1_i32 : i32
    %c16_i32_1 = arith.constant 16 : i32
    %8 = arith.muli %7, %c16_i32_1 : i32
    %9 = tpu.assume_multiple %8, 8 : i32
    %c0_2 = arith.constant 0 : index
    %10 = arith.index_cast %9 : i32 to index
    %c0_3 = arith.constant 0 : index
    %11 = vector.load %arg2[%c0_2, %10, %c0_3] : memref<1x288x48xbf16, #tpu.memory_space<vmem>>, vector<1x128x48xbf16>
    %12 = vector.shape_cast %11 : vector<1x128x48xbf16> to vector<128x48xbf16>
    %c2_i32 = arith.constant 2 : i32
    %13 = arith.addi %0, %c2_i32 : i32
    %c16_i32_4 = arith.constant 16 : i32
    %14 = arith.muli %13, %c16_i32_4 : i32
    %15 = tpu.assume_multiple %14, 8 : i32
    %c0_5 = arith.constant 0 : index
    %16 = arith.index_cast %15 : i32 to index
    %c0_6 = arith.constant 0 : index
    %17 = vector.load %arg2[%c0_5, %16, %c0_6] : memref<1x288x48xbf16, #tpu.memory_space<vmem>>, vector<1x128x48xbf16>
    %18 = vector.shape_cast %17 : vector<1x128x48xbf16> to vector<128x48xbf16>
    %19 = tpu.concatenate %6, %12, %18 in 1 : vector<128x48xbf16>, vector<128x48xbf16>, vector<128x48xbf16> -> vector<128x144xbf16>
    %c0_7 = arith.constant 0 : index
    %c0_8 = arith.constant 0 : index
    %20 = vector.load %arg4[%c0_7, %c0_8] : memref<144x16xbf16, #tpu.memory_space<vmem>>, vector<144x16xbf16>
    %cst = arith.constant dense<0.000000e+00> : vector<128x16xf32>
    %21 = tpu.matmul %19, %20, %cst {dimension_numbers = #tpu.dot_dimension_numbers<[1], [0], [0], [1], [0, 0, 1, 1], [], []>} : vector<128x144xbf16>, vector<144x16xbf16>, vector<128x16xf32> -> vector<128x16xf32>
    %c0_9 = arith.constant 0 : index
    %c0_10 = arith.constant 0 : index
    %22 = vector.load %arg5[%c0_9, %c0_10] : memref<1x16xf32, #tpu.memory_space<vmem>>, vector<1x16xf32>
    %23 = vector.broadcast %22 : vector<1x16xf32> to vector<128x16xf32>
    %24 = arith.addf %21, %23 : vector<128x16xf32>
    %25 = arith.mulf %24, %24 : vector<128x16xf32>
    %c0_11 = arith.constant 0 : index
    %c0_12 = arith.constant 0 : index
    %26 = vector.load %arg6[%c0_11, %c0_12] : memref<16x16xf32, #tpu.memory_space<vmem>>, vector<16x16xf32>
    %cst_13 = arith.constant dense<0.000000e+00> : vector<128x16xf32>
    %27 = tpu.matmul %25, %26, %cst_13 {dimension_numbers = #tpu.dot_dimension_numbers<[1], [0], [0], [1], [0, 0, 1, 1], [], []>} : vector<128x16xf32>, vector<16x16xf32>, vector<128x16xf32> -> vector<128x16xf32>
    %c0_14 = arith.constant 0 : index
    %c0_15 = arith.constant 0 : index
    %28 = vector.load %arg7[%c0_14, %c0_15] : memref<1x16xf32, #tpu.memory_space<vmem>>, vector<1x16xf32>
    %29 = vector.broadcast %28 : vector<1x16xf32> to vector<128x16xf32>
    %30 = arith.addf %27, %29 : vector<128x16xf32>
    %31 = math.sqrt %30 : vector<128x16xf32>
    %32 = arith.mulf %24, %31 : vector<128x16xf32>
    %c0_16 = arith.constant 0 : index
    %c0_17 = arith.constant 0 : index
    %c0_18 = arith.constant 0 : index
    %33 = vector.load %arg3[%c0_16, %c0_17, %c0_18] : memref<1x128x16xbf16, #tpu.memory_space<vmem>>, vector<1x128x16xbf16>
    %34 = vector.shape_cast %33 : vector<1x128x16xbf16> to vector<128x16xbf16>
    %35 = arith.extf %34 : vector<128x16xbf16> to vector<128x16xf32>
    %36 = arith.addf %35, %32 : vector<128x16xf32>
    %c0_19 = arith.constant 0 : index
    %c0_20 = arith.constant 0 : index
    %c0_21 = arith.constant 0 : index
    %37 = vector.load %arg8[%c0_19, %c0_20, %c0_21] : memref<1x128x16xf32, #tpu.memory_space<vmem>>, vector<1x128x16xf32>
    %38 = vector.shape_cast %37 : vector<1x128x16xf32> to vector<128x16xf32>
    %39 = vector.shape_cast %36 : vector<128x16xf32> to vector<1x128x16xf32>
    tpu.vector_store %arg8[%c0_19, %c0_20, %c0_21], %39 {strides = array<i32>} : memref<1x128x16xf32, #tpu.memory_space<vmem>>, vector<1x128x16xf32>,
    return
  }
  func.func @transform_0(%arg0: i32, %arg1: i32) -> (i32, i32, i32) {
    %c0_i32 = arith.constant 0 : i32
    %c0_i32_0 = arith.constant 0 : i32
    %c0_i32_1 = arith.constant 0 : i32
    return %arg0, %c0_i32, %c0_i32_0 : i32, i32, i32
  }
  func.func @transform_1(%arg0: i32, %arg1: i32) -> (i32, i32, i32) {
    %c0_i32 = arith.constant 0 : i32
    %c0_i32_0 = arith.constant 0 : i32
    return %arg0, %arg1, %c0_i32 : i32, i32, i32
  }
  func.func @transform_2(%arg0: i32, %arg1: i32) -> (i32, i32) {
    %c0_i32 = arith.constant 0 : i32
    %c0_i32_0 = arith.constant 0 : i32
    %c0_i32_1 = arith.constant 0 : i32
    return %c0_i32, %c0_i32_0 : i32, i32
  }
  func.func @transform_3(%arg0: i32, %arg1: i32) -> (i32, i32) {
    %c0_i32 = arith.constant 0 : i32
    %c0_i32_0 = arith.constant 0 : i32
    %c0_i32_1 = arith.constant 0 : i32
    return %c0_i32, %c0_i32_0 : i32, i32
  }
  func.func @transform_4(%arg0: i32, %arg1: i32) -> (i32, i32) {
    %c0_i32 = arith.constant 0 : i32
    %c0_i32_0 = arith.constant 0 : i32
    %c0_i32_1 = arith.constant 0 : i32
    return %c0_i32, %c0_i32_0 : i32, i32
  }
  func.func @transform_5(%arg0: i32, %arg1: i32) -> (i32, i32) {
    %c0_i32 = arith.constant 0 : i32
    %c0_i32_0 = arith.constant 0 : i32
    %c0_i32_1 = arith.constant 0 : i32
    return %c0_i32, %c0_i32_0 : i32, i32
  }
  func.func @transform_6(%arg0: i32, %arg1: i32) -> (i32, i32, i32) {
    %c0_i32 = arith.constant 0 : i32
    %c0_i32_0 = arith.constant 0 : i32
    return %arg0, %arg1, %c0_i32 : i32, i32, i32
  }
}

</mosaic_0001>

<bundles_post_ra>
// kernel: residual_block_upsample.2
= control target key start
LH: loop header
LB: loop body
LE: loop exit
PB: predicated region body
PF: predicated region fallthrough
CT: control target
= control target key end

     0   :  { %s1034_s15 = smov 0   ;;  %s1036_s16 = smov 0   ;;  %s1248_s0 = inlined_call_operand.vmem [shape: bf16[2,288,12], index: 0, kind: input, shape index: {}]   ;;  %s1249_s1 = inlined_call_operand.vmem [shape: bf16[36,32], index: 1, kind: input, shape index: {}]   ;;  %s1250_s2 = inlined_call_operand.vmem [shape: f32[1,32], index: 2, kind: input, shape index: {}]   ;;  %s1251_s3 = inlined_call_operand.vmem [shape: f32[1,32], index: 3, kind: input, shape index: {}]   ;;  %s1252_s4 = inlined_call_operand.vmem [shape: bf16[2,256,32], index: 4, kind: output, shape index: {}]  }
   0x1   :  { %s1038_s17 = smov 0   ;;  %s1040_s18 = smov 0  }
   0x2   :  { %s1042_s19 = smov 0  }
   0x3 LB: > { %s23_s20 = sadd.s32 1, %s997_s17  ;;  %s26_s21 = sadd.s32 1, %s1001_s18  ;;  %s1005_s19 = sphi %s1042_s19, %s14_s19   ;;  %s1001_s18 = sphi %s1040_s18, %s1256_s18   ;;  %s997_s17 = sphi %s1038_s17, %s1255_s17   ;;  %s993_s16 = sphi %s1036_s16, %s1254_s16   ;;  %s989_s15 = sphi %s1034_s15, %s1253_s15  }
   0x4   : > { %p24_p0 = scmp.ge.s32.totalorder %s23_s20, 2  ;;  %p755_p1 = scmp.ge.s32.totalorder %s1005_s19, 1 }
   0x5   : > { %p176_p2 = scmp.lt.s32.totalorder %s1005_s19, 5 }
   0x6   : > { %s1258_s20 = smov (%p24_p0, %s23_s20), 0  ;;  %s1260_s21 = smov (!%p24_p0, %s26_s21), %s1001_s18 }
   0x7   : > { %p177_p3 = pnand %p755_p1, %p176_p2  ;;  %p28_p4 = scmp.ge.s32.totalorder %s1260_s21, 2 }
   0x8   : > { %p206_p5 = scmp.lt.s32.totalorder (!%p177_p3), %s993_s16, 1  ;;  %s761_s22 = sshll.u32 (!%p177_p3), %s989_s15, 7 }
   0x9   : > { %s1262_s21 = smov (%p28_p4, %s1260_s21), 0  ;;  %180 = sbr.rel (%p177_p3) target bundleno = 319 (0x13f), region = 36 }
   0xa   : > { %s224_s23 = sshra.s32 (!%p177_p3), %s761_s22, 3  ;;  %s900_s24 = sadd.s32 (!%p177_p3), 32, %s761_s22 }
   0xb   : > { %s268_s25 = sshra.s32 (!%p177_p3), %s900_s24, 3  ;;  %s762_s27 = sshll.u32 (!%p177_p3), %s224_s23, 2 }
   0xc   : > { %s766_s28 = sshll.u32 (!%p177_p3), %s268_s25, 2  ;;  %s890_s6 = sadd.s32 (!%p177_p3), 16, %s761_s22 }
   0xd   : > { %s246_s9 = sshra.s32 (!%p177_p3), %s890_s6, 3  ;;  %s1007_s11 = smov (!%p177_p3), 24  }
   0xe   : > { %s1264_s16 = smov (!%p206_p5, %s993_s16), 1  ;;  %s764_s10 = sshll.u32 %s246_s9, 2  ;;  %v486_v6 = vld [vmem:[%s1249_s1 + $0x10] sm:$0x3]  ;;  %vm523_vm0 = vcmask 1041408   ;;  %v910_v13 = vld [vmem:[%s1249_s1 + $0x8] sm:$0xff] }
   0xf   : > { %s922_s26 = smul.u32 144, %s1264_s16  ;;  %s1008_s13 = smov 12   ;;  %v500_v8 = vunpack.c.l.b16 %v486_v6  ;;  %v909_v15 = vld [vmem:[%s1249_s1] sm:$0xff]  ;;  %vm440_vm1 = vcmask 97280   ;;  %vm465_vm2 = vcmask 195584   ;;  %vm506_vm3 = vcmask 293888  }
  0x10   : > { %v1157_v62 = vld [vmem:[%s1250_s2] ss:$0 sm:$0xff]  ;;  %vm644_vm5 = vcmask 257024  }
  0x11   : > { %s210_s5 = scalar_lea.vmem %s1248_s0, %s922_s26  ;;  %v503_v9 = vpack.c.b16 %v500_v8, %v500_v8  ;;  %v1162_v63 = vld [vmem:[%s1251_s3] ss:$0 sm:$0xff] }
  0x12   : > { %s1073_s7 = scalar_lea.vmem %s210_s5, %s766_s28  ;;  %s1075_s8 = scalar_lea.vmem %s210_s5, %s762_s27 }
  0x13   : > { %v905_v0 = vld [vmem:[%s1073_s7 + $0x20] sm:$0xff]  ;;  %s1079_s12 = scalar_lea.vmem %s210_s5, %s764_s10  ;;  %v907_v3 = vld [vmem:[%s1073_s7 + $0x30] sm:$0xff]  ;;  %v525_v12 = vsel %vm523_vm0, %v503_v9, 0  ;;  %v906_v14 = vld [vmem:[%s1073_s7 + $0x28] sm:$0xff]  ;;  %s757_s27 = sshll.u32 %s989_s15, 4 }
  0x14   : > { %432 = vrot.lane.b32.xlu1 %v905_v0, %s1007_s11  ;;  %v895_v1 = vld [vmem:[%s1079_s12 + $0x20] sm:$0xff]  ;;  %v897_v4 = vld [vmem:[%s1079_s12 + $0x30] sm:$0xff]  ;;  %v896_v11 = vld [vmem:[%s1079_s12 + $0x28] sm:$0xff]  ;;  %914 = vmatpush.bf16.msra.mxu2 %v525_v12  ;;  %p214_p6 = scmp.lt.s32.totalorder %s757_s27, 31  ;;  %s758_s28 = sshll.u32 %s1264_s16, 5 }
  0x15   : > { %v891_v2 = vld [vmem:[%s1079_s12] sm:$0xff]  ;;  %376 = vrot.lane.b32.xlu0 %v895_v1, %s1008_s13  ;;  %v893_v5 = vld [vmem:[%s1079_s12 + $0x10] sm:$0xff]  ;;  %915 = vmatpush.bf16.msra.mxu3 %v525_v12  ;;  %v898_v16 = vld [vmem:[%s1079_s12 + $0x38] sm:$0xff] }
  0x16   : > { %368 = vrot.lane.b32.xlu2 %v891_v2, %s1008_s13  ;;  %v903_v7 = vld [vmem:[%s1073_s7 + $0x10] sm:$0xff]  ;;  %v901_v10 = vld [vmem:[%s1073_s7] sm:$0xff]  ;;  %532 = vmatpush.bf16.msra.mxu0 %v525_v12  ;;  %v908_v17 = vld [vmem:[%s1073_s7 + $0x38] sm:$0xff]  ;;  %s1266_s27 = smov (!%p214_p6, %s757_s27), 31 }
  0x17   : > { %913 = vmatpush.bf16.msra.mxu1 %v525_v12  ;;  %v894_v18 = vld [vmem:[%s1079_s12 + $0x18] sm:$0xff]  ;;  %v892_v19 = vld [vmem:[%s1079_s12 + $0x8] sm:$0xff]  ;;  %v885_v24 = vld [vmem:[%s1075_s8 + $0x20] sm:$0xff]  ;;  %s217_s5 = sadd.s32 %s758_s28, %s1266_s27 }
  0x18   : > { %917 = vmatpush.bf16.msra.mxu2 %v910_v13  ;;  %v902_v20 = vld [vmem:[%s1073_s7 + $0x8] sm:$0xff]  ;;  %v904_v21 = vld [vmem:[%s1073_s7 + $0x18] sm:$0xff]  ;;  %v887_v30 = vld [vmem:[%s1075_s8 + $0x30] sm:$0xff] }
  0x19   : > { %918 = vmatpush.bf16.msra.mxu3 %v910_v13  ;;  %v883_v31 = vld [vmem:[%s1075_s8 + $0x10] sm:$0xff]  ;;  %v881_v37 = vld [vmem:[%s1075_s8] sm:$0xff]  ;;  %v886_v40 = vld [vmem:[%s1075_s8 + $0x28] sm:$0xff] }
  0x1a   : > { %533 = vmatpush.bf16.msra.mxu0 %v910_v13  ;;  %v888_v46 = vld [vmem:[%s1075_s8 + $0x38] sm:$0xff]  ;;  %v882_v52 = vld [vmem:[%s1075_s8 + $0x8] sm:$0xff] }
  0x1b   : > { %916 = vmatpush.bf16.msra.mxu1 %v910_v13  ;;  %v884_v57 = vld [vmem:[%s1075_s8 + $0x18] sm:$0xff]  ;;  %s759_s8 = sshll.u32 %s217_s5, 2 }
  0x1c   : > { %436 = vrot.lane.b32.xlu1 %v907_v3, %s1007_s11  ;;  %920 = vmatpush.bf16.msra.mxu2 %v909_v15  ;;  %s1169_s9 = scalar_lea.vmem %s1252_s4, %s759_s8 }
  0x1d   : > { %380 = vrot.lane.b32.xlu0 %v897_v4, %s1008_s13  ;;  %921 = vmatpush.bf16.msra.mxu3 %v909_v15 }
  0x1e   : > { %372 = vrot.lane.b32.xlu2 %v893_v5, %s1008_s13  ;;  %534 = vmatpush.bf16.msra.mxu0 %v909_v15 }
  0x1f   : > { %919 = vmatpush.bf16.msra.mxu1 %v909_v15 }
  0x24   : > { %428 = vrot.lane.b32.xlu1 %v903_v7, %s1007_s11 }
  0x25   : > { %424 = vrot.lane.b32.xlu0 %v901_v10, %s1007_s11 }
  0x26   : > { %378 = vrot.lane.b32.xlu2 %v896_v11, %s1008_s13 }
  0x2c   : > { %434 = vrot.lane.b32.xlu1 %v906_v14, %s1007_s11 }
  0x2d   : > { %382 = vrot.lane.b32.xlu0 %v898_v16, %s1008_s13 }
  0x2e   : > { %438 = vrot.lane.b32.xlu2 %v908_v17, %s1007_s11 }
  0x34   : > { %374 = vrot.lane.b32.xlu1 %v894_v18, %s1008_s13 }
  0x35   : > { %370 = vrot.lane.b32.xlu0 %v892_v19, %s1008_s13 }
  0x36   : > { %426 = vrot.lane.b32.xlu2 %v902_v20, %s1007_s11 }
  0x3d   : > { %430 = vrot.lane.b32.xlu0 %v904_v21, %s1007_s11 }
  0x70   : > { %v369_v22 = vpop.permute.xlu2 %368 }
  0x71   : > { %v443_v41 = vsel %vm440_vm1, %v881_v37, %v369_v22 }
  0x78   : > { %v373_v27 = vpop.permute.xlu2 %372 }
  0x79   : > { %v449_v35 = vsel %vm440_vm1, %v883_v31, %v373_v27 }
  0x80   : > { %v379_v36 = vpop.permute.xlu2 %378 }
  0x81   : > { %v458_v44 = vsel %vm440_vm1, %v886_v40, %v379_v36 }
  0x86   : > { %v433_v23 = vpop.permute.xlu1 %432 }
  0x87   : > { %v377_v25 = vpop.permute.xlu0 %376 }
  0x88   : > { %v455_v26 = vsel %vm440_vm1, %v885_v24, %v377_v25  ;;  %v439_v47 = vpop.permute.xlu2 %438 }
  0x89   : > { %v475_v28 = vsel %vm465_vm2, %v455_v26, %v433_v23 }
  0x8a   : > { %875 = vmatmul.msk.bf16.vlgmr.msra.gmra.mxu2 %vm506_vm3, %v475_v28 }
  0x8e   : > { %v437_v29 = vpop.permute.xlu1 %436 }
  0x8f   : > { %v381_v32 = vpop.permute.xlu0 %380 }
  0x90   : > { %v461_v33 = vsel %vm440_vm1, %v887_v30, %v381_v32  ;;  %v427_v53 = vpop.permute.xlu2 %426 }
  0x91   : > { %v479_v34 = vsel %vm465_vm2, %v461_v33, %v437_v29 }
  0x92   : > { %877 = vmatmul.msk.bf16.vlgmr.msra.gmra.mxu3 %vm506_vm3, %v479_v34 }
  0x96   : > { %v429_v38 = vpop.permute.xlu1 %428 }
  0x97   : > { %v471_v39 = vsel %vm465_vm2, %v449_v35, %v429_v38  ;;  %v425_v42 = vpop.permute.xlu0 %424 }
  0x98   : > { %873 = vmatmul.msk.bf16.vlgmr.msra.gmra.mxu1 %vm506_vm3, %v471_v39  ;;  %v467_v43 = vsel %vm465_vm2, %v443_v41, %v425_v42 }
  0x99   : > { %871 = vmatmul.msk.bf16.vlgmr.msra.gmra.mxu0 %vm506_vm3, %v467_v43 }
  0x9e   : > { %v435_v45 = vpop.permute.xlu1 %434 }
  0x9f   : > { %v477_v48 = vsel %vm465_vm2, %v458_v44, %v435_v45  ;;  %v383_v49 = vpop.permute.xlu0 %382 }
  0xa0   : > { %876 = vmatmul.msk.bf16.gmra.mxu2 %vm506_vm3, %v477_v48  ;;  %v464_v50 = vsel %vm440_vm1, %v888_v46, %v383_v49 }
  0xa1   : > { %v481_v51 = vsel %vm465_vm2, %v464_v50, %v439_v47 }
  0xa2   : > { %878 = vmatmul.msk.bf16.gmra.mxu3 %vm506_vm3, %v481_v51 }
  0xa6   : > { %v375_v58 = vpop.permute.xlu1 %374 }
  0xa7   : > { %v371_v54 = vpop.permute.xlu0 %370  ;;  %v452_v59 = vsel %vm440_vm1, %v884_v57, %v375_v58 }
  0xa8   : > { %v446_v55 = vsel %vm440_vm1, %v882_v52, %v371_v54 }
  0xa9   : > { %v469_v56 = vsel %vm465_vm2, %v446_v55, %v427_v53 }
  0xaa   : > { %872 = vmatmul.msk.bf16.gmra.mxu0 %vm506_vm3, %v469_v56 }
  0xaf   : > { %v431_v60 = vpop.permute.xlu0 %430 }
  0xb0   : > { %v473_v61 = vsel %vm465_vm2, %v452_v59, %v431_v60 }
  0xb1   : > { %874 = vmatmul.msk.bf16.gmra.mxu1 %vm506_vm3, %v473_v61 }
 0x10d   : > { %v556_v0 = vpop.f32.mrf.mxu2 }
 0x10e   : > { %v557_v1 = vadd.f32 %v1157_v62, %v556_v0 }
 0x110   : > { %vm584_vm4 = vcmp.ge.f32.partialorder %v557_v1, 0.0  ;;  %v604_v2 = vmul.f32 %v1162_v63, %v557_v1 }
 0x112   : > { %v620_v3 = vsel %vm584_vm4, %v557_v1, %v604_v2 }
 0x113   : > { %v636_v4 = vpack.c.bf16 %v620_v3, %v620_v3 }
 0x115   : > { %v546_v5 = vpop.f32.mrf.mxu1  ;;  %653 = vst.msk [vmem:[%s1169_s9 + $0x20] sm:$0xf] %vm644_vm5, %v636_v4  ;;  %v558_v7 = vpop.f32.mrf.mxu2 }
 0x116   : > { %v547_v6 = vadd.f32 %v1157_v62, %v546_v5  ;;  %v566_v8 = vpop.f32.mrf.mxu3  ;;  %v559_v9 = vadd.f32 %v1157_v62, %v558_v7  ;;  %v536_v11 = vpop.f32.mrf.mxu0 }
 0x117   : > { %v567_v10 = vadd.f32 %v1157_v62, %v566_v8  ;;  %v537_v13 = vadd.f32 %v1157_v62, %v536_v11 }
 0x118   : > { %vm580_vm6 = vcmp.ge.f32.partialorder %v547_v6, 0.0  ;;  %v600_v12 = vmul.f32 %v1162_v63, %v547_v6  ;;  %vm585_vm7 = vcmp.ge.f32.partialorder %v559_v9, 0.0  ;;  %v605_v14 = vmul.f32 %v1162_v63, %v559_v9 }
 0x119   : > { %vm588_vm8 = vcmp.ge.f32.partialorder %v567_v10, 0.0  ;;  %v608_v15 = vmul.f32 %v1162_v63, %v567_v10  ;;  %vm576_vm9 = vcmp.ge.f32.partialorder %v537_v13, 0.0  ;;  %v596_v16 = vmul.f32 %v1162_v63, %v537_v13 }
 0x11a   : > { %v616_v17 = vsel %vm580_vm6, %v547_v6, %v600_v12  ;;  %v621_v18 = vsel %vm585_vm7, %v559_v9, %v605_v14 }
 0x11b   : > { %v624_v19 = vsel %vm588_vm8, %v567_v10, %v608_v15  ;;  %v632_v20 = vpack.c.bf16 %v616_v17, %v616_v17  ;;  %v637_v21 = vpack.c.bf16 %v621_v18, %v621_v18  ;;  %v612_v23 = vsel %vm576_vm9, %v537_v13, %v596_v16 }
 0x11c   : > { %v640_v22 = vpack.c.bf16 %v624_v19, %v624_v19  ;;  %v628_v25 = vpack.c.bf16 %v612_v23, %v612_v23 }
 0x11d   : > { %v548_v24 = vpop.f32.mrf.mxu1  ;;  %649 = vst.msk [vmem:[%s1169_s9 + $0x10] sm:$0xf] %vm644_vm5, %v632_v20 }
 0x11e   : > { %v549_v26 = vadd.f32 %v1157_v62, %v548_v24  ;;  %654 = vst.msk [vmem:[%s1169_s9 + $0x24] sm:$0xf] %vm644_vm5, %v637_v21  ;;  %v568_v27 = vpop.f32.mrf.mxu3  ;;  %v538_v29 = vpop.f32.mrf.mxu0 }
 0x11f   : > { %657 = vst.msk [vmem:[%s1169_s9 + $0x30] sm:$0xf] %vm644_vm5, %v640_v22  ;;  %v569_v28 = vadd.f32 %v1157_v62, %v568_v27  ;;  %v539_v31 = vadd.f32 %v1157_v62, %v538_v29 }
 0x120   : > { %vm581_vm10 = vcmp.ge.f32.partialorder %v549_v26, 0.0  ;;  %v601_v30 = vmul.f32 %v1162_v63, %v549_v26  ;;  %645 = vst.msk [vmem:[%s1169_s9] sm:$0xf] %vm644_vm5, %v628_v25 }
 0x121   : > { %vm589_vm11 = vcmp.ge.f32.partialorder %v569_v28, 0.0  ;;  %v609_v32 = vmul.f32 %v1162_v63, %v569_v28  ;;  %vm577_vm12 = vcmp.ge.f32.partialorder %v539_v31, 0.0  ;;  %v597_v34 = vmul.f32 %v1162_v63, %v539_v31 }
 0x122   : > { %v617_v33 = vsel %vm581_vm10, %v549_v26, %v601_v30 }
 0x123   : > { %v633_v35 = vpack.c.bf16 %v617_v33, %v617_v33  ;;  %v561_v36 = vpop.f32.mrf.mxu2  ;;  %v625_v37 = vsel %vm589_vm11, %v569_v28, %v609_v32  ;;  %v613_v40 = vsel %vm577_vm12, %v539_v31, %v597_v34 }
 0x124   : > { %v562_v38 = vadd.f32 %v1157_v62, %v561_v36  ;;  %v641_v39 = vpack.c.bf16 %v625_v37, %v625_v37  ;;  %v629_v41 = vpack.c.bf16 %v613_v40, %v613_v40 }
 0x125   : > { %650 = vst.msk [vmem:[%s1169_s9 + $0x14] sm:$0xf] %vm644_vm5, %v633_v35 }
 0x126   : > { %vm586_vm13 = vcmp.ge.f32.partialorder %v562_v38, 0.0  ;;  %v606_v42 = vmul.f32 %v1162_v63, %v562_v38  ;;  %658 = vst.msk [vmem:[%s1169_s9 + $0x34] sm:$0xf] %vm644_vm5, %v641_v39  ;;  %v571_v43 = vpop.f32.mrf.mxu3 }
 0x127   : > { %646 = vst.msk [vmem:[%s1169_s9 + $0x4] sm:$0xf] %vm644_vm5, %v629_v41  ;;  %v572_v45 = vadd.f32 %v1157_v62, %v571_v43  ;;  %v541_v47 = vpop.f32.mrf.mxu0 }
 0x128   : > { %v622_v44 = vsel %vm586_vm13, %v562_v38, %v606_v42  ;;  %v542_v49 = vadd.f32 %v1157_v62, %v541_v47 }
 0x129   : > { %v638_v46 = vpack.c.bf16 %v622_v44, %v622_v44  ;;  %vm590_vm14 = vcmp.ge.f32.partialorder %v572_v45, 0.0  ;;  %v610_v48 = vmul.f32 %v1162_v63, %v572_v45 }
 0x12a   : > { %vm578_vm15 = vcmp.ge.f32.partialorder %v542_v49, 0.0  ;;  %v598_v52 = vmul.f32 %v1162_v63, %v542_v49 }
 0x12b   : > { %655 = vst.msk [vmem:[%s1169_s9 + $0x28] sm:$0xf] %vm644_vm5, %v638_v46  ;;  %v563_v50 = vpop.f32.mrf.mxu2  ;;  %v626_v51 = vsel %vm590_vm14, %v572_v45, %v610_v48 }
 0x12c   : > { %v564_v53 = vadd.f32 %v1157_v62, %v563_v50  ;;  %v642_v54 = vpack.c.bf16 %v626_v51, %v626_v51  ;;  %v614_v55 = vsel %vm578_vm15, %v542_v49, %v598_v52 }
 0x12d   : > { %v630_v57 = vpack.c.bf16 %v614_v55, %v614_v55 }
 0x12e   : > { %vm587_vm0 = vcmp.ge.f32.partialorder %v564_v53, 0.0  ;;  %v607_v56 = vmul.f32 %v1162_v63, %v564_v53  ;;  %659 = vst.msk [vmem:[%s1169_s9 + $0x38] sm:$0xf] %vm644_vm5, %v642_v54  ;;  %v573_v58 = vpop.f32.mrf.mxu3  ;;  %v551_v61 = vpop.f32.mrf.mxu1 }
 0x12f   : > { %v574_v60 = vadd.f32 %v1157_v62, %v573_v58  ;;  %647 = vst.msk [vmem:[%s1169_s9 + $0x8] sm:$0xf] %vm644_vm5, %v630_v57  ;;  %v552_v1 = vadd.f32 %v1157_v62, %v551_v61  ;;  %v543_v2 = vpop.f32.mrf.mxu0 }
 0x130   : > { %v623_v59 = vsel %vm587_vm0, %v564_v53, %v607_v56  ;;  %v544_v4 = vadd.f32 %v1157_v62, %v543_v2 }
 0x131   : > { %v639_v0 = vpack.c.bf16 %v623_v59, %v623_v59  ;;  %vm591_vm1 = vcmp.ge.f32.partialorder %v574_v60, 0.0  ;;  %v611_v3 = vmul.f32 %v1162_v63, %v574_v60  ;;  %vm582_vm2 = vcmp.ge.f32.partialorder %v552_v1, 0.0 }
 0x132   : > { %v602_v5 = vmul.f32 %v1162_v63, %v552_v1  ;;  %vm579_vm3 = vcmp.ge.f32.partialorder %v544_v4, 0.0  ;;  %v599_v7 = vmul.f32 %v1162_v63, %v544_v4 }
 0x133   : > { %656 = vst.msk [vmem:[%s1169_s9 + $0x2c] sm:$0xf] %vm644_vm5, %v639_v0  ;;  %v627_v6 = vsel %vm591_vm1, %v574_v60, %v611_v3 }
 0x134   : > { %v643_v8 = vpack.c.bf16 %v627_v6, %v627_v6  ;;  %v618_v9 = vsel %vm582_vm2, %v552_v1, %v602_v5  ;;  %v615_v11 = vsel %vm579_vm3, %v544_v4, %v599_v7 }
 0x135   : > { %v634_v10 = vpack.c.bf16 %v618_v9, %v618_v9  ;;  %v631_v12 = vpack.c.bf16 %v615_v11, %v615_v11 }
 0x136   : > { %660 = vst.msk [vmem:[%s1169_s9 + $0x3c] sm:$0xf] %vm644_vm5, %v643_v8  ;;  %v553_v13 = vpop.f32.mrf.mxu1 }
 0x137   : > { %651 = vst.msk [vmem:[%s1169_s9 + $0x18] sm:$0xf] %vm644_vm5, %v634_v10  ;;  %v554_v14 = vadd.f32 %v1157_v62, %v553_v13 }
 0x138   : > { %648 = vst.msk [vmem:[%s1169_s9 + $0xc] sm:$0xf] %vm644_vm5, %v631_v12 }
 0x139   : > { %vm583_vm4 = vcmp.ge.f32.partialorder %v554_v14, 0.0  ;;  %v603_v15 = vmul.f32 %v1162_v63, %v554_v14 }
 0x13b   : > { %v619_v16 = vsel %vm583_vm4, %v554_v14, %v603_v15 }
 0x13c   : > { %v635_v17 = vpack.c.bf16 %v619_v16, %v619_v16 }
 0x13e   : > { %652 = vst.msk [vmem:[%s1169_s9 + $0x1c] sm:$0xf] %vm644_vm5, %v635_v17 }
 0x13f PF: > { %s14_s19 = sadd.s32 1, %s1005_s19   ;;  %s1253_s15 = smov %s997_s17 }
 0x140   : > { %p11_p7 = scmp.ge.s32.totalorder %s14_s19, 6   ;;  %s1254_s16 = smov %s1001_s18 }
 0x141   : > { %s1255_s17 = smov %s1258_s20  ;;  %s1256_s18 = smov %s1262_s21 }
 0x142   :  { %13 = sbr.rel (!%p11_p7) target bundleno = 3 (0x3), region = 69 }

// kernel: residual_block_upsample.3
= control target key start
LH: loop header
LB: loop body
LE: loop exit
PB: predicated region body
PF: predicated region fallthrough
CT: control target
= control target key end

     0   :  { %s1706_s21 = smov 0   ;;  %s1708_s22 = smov 0   ;;  %s2117_s0 = inlined_call_operand.vmem [shape: bf16[2,288,48], index: 0, kind: input, shape index: {}]   ;;  %s2118_s1 = inlined_call_operand.vmem [shape: bf16[2,256,16], index: 1, kind: input, shape index: {}]   ;;  %s2119_s2 = inlined_call_operand.vmem [shape: bf16[144,16], index: 2, kind: input, shape index: {}]   ;;  %s2120_s3 = inlined_call_operand.vmem [shape: f32[1,16], index: 3, kind: input, shape index: {}]   ;;  %s2121_s4 = inlined_call_operand.vmem [shape: f32[16,16], index: 4, kind: input, shape index: {}]   ;;  %s2122_s5 = inlined_call_operand.vmem [shape: f32[1,16], index: 5, kind: input, shape index: {}]   ;;  %s2123_s6 = inlined_call_operand.vmem [shape: f32[2,256,16], index: 6, kind: output, shape index: {}]  }
   0x1   :  { %s1710_s23 = smov 0   ;;  %s1712_s24 = smov 0  }
   0x2   :  { %s1714_s25 = smov 0  }
   0x3 LB: > { %s25_s26 = sadd.s32 1, %s1659_s23  ;;  %s28_s27 = sadd.s32 1, %s1663_s24  ;;  %s1667_s25 = sphi %s1714_s25, %s16_s25   ;;  %s1663_s24 = sphi %s1712_s24, %s2127_s24   ;;  %s1659_s23 = sphi %s1710_s23, %s2126_s23   ;;  %s1655_s22 = sphi %s1708_s22, %s2125_s22   ;;  %s1651_s21 = sphi %s1706_s21, %s2124_s21  }
   0x4   : > { %p26_p0 = scmp.ge.s32.totalorder %s25_s26, 2  ;;  %p1290_p1 = scmp.ge.s32.totalorder %s1667_s25, 1 }
   0x5   : > { %p243_p2 = scmp.lt.s32.totalorder %s1667_s25, 5 }
   0x6   : > { %s2129_s26 = smov (%p26_p0, %s25_s26), 0  ;;  %s2131_s27 = smov (!%p26_p0, %s28_s27), %s1663_s24 }
   0x7   : > { %p244_p3 = pnand %p1290_p1, %p243_p2  ;;  %p30_p4 = scmp.ge.s32.totalorder %s2131_s27, 2 }
   0x8   : > { %p286_p5 = scmp.lt.s32.totalorder (!%p244_p3), %s1655_s22, 1  ;;  %s1299_s28 = sshll.u32 (!%p244_p3), %s1651_s21, 7 }
   0x9   : > { %s2133_s27 = smov (%p30_p4, %s2131_s27), 0  ;;  %247 = sbr.rel (%p244_p3) target bundleno = 540 (0x21c), region = 44 }
   0xa   : > { %s314_s29 = sshra.s32 (!%p244_p3), %s1299_s28, 3  ;;  %s1472_s30 = sadd.s32 (!%p244_p3), 16, %s1299_s28 }
   0xb   : > { %s1300_s7 = sshll.u32 (!%p244_p3), %s314_s29, 2  ;;  %s336_s8 = sshra.s32 (!%p244_p3), %s1472_s30, 3 }
   0xc   : > { %s1302_s10 = sshll.u32 (!%p244_p3), %s336_s8, 2  ;;  %s1482_s11 = sadd.s32 (!%p244_p3), 32, %s1299_s28 }
   0xd   : > { %s358_s15 = sshra.s32 (!%p244_p3), %s1482_s11, 3  ;;  %s1669_s19 = smov (!%p244_p3), 48  }
   0xe   : > { %s2135_s22 = smov (!%p286_p5, %s1655_s22), 1  ;;  %s1304_s18 = sshll.u32 %s358_s15, 2  ;;  %v1498_v6 = vld [vmem:[%s2119_s2 + $0x38] sm:$0xff]  ;;  %v1497_v7 = vld [vmem:[%s2119_s2 + $0x30] sm:$0xff]  ;;  %v1496_v11 = vld [vmem:[%s2119_s2 + $0x28] sm:$0xff]  ;;  %vm530_vm0 = vcmask 392192  }
   0xf   : > { %s1552_s9 = smul.u32 144, %s2135_s22  ;;  %s1670_s28 = smov 96   ;;  %673 = vmatpush.bf16.msra.mxu0 %v1498_v6  ;;  %1541 = vmatpush.bf16.msra.mxu3 %v1498_v6  ;;  %v1495_v12 = vld [vmem:[%s2119_s2 + $0x20] sm:$0xff]  ;;  %v1494_v16 = vld [vmem:[%s2119_s2 + $0x18] sm:$0xff]  ;;  %v1493_v17 = vld [vmem:[%s2119_s2 + $0x10] sm:$0xff]  ;;  %vm656_vm1 = vcmask 130048  }
  0x10   : > { %v1492_v22 = vld [vmem:[%s2119_s2 + $0x8] sm:$0xff]  ;;  %v1499_v23 = vld [vmem:[%s2119_s2 + $0x40] sm:$0xff]  ;;  %vm555_vm2 = vcmask 785408   ;;  %s1293_s15 = sshll.u32 %s2135_s22, 5 }
  0x11   : > { %s290_s14 = scalar_lea.vmem %s2117_s0, %s1552_s9  ;;  %729 = vmatpush.bf16.msra.mxu1 %v1499_v23  ;;  %v1491_v24 = vld [vmem:[%s2119_s2] sm:$0xff] }
  0x12   : > { %s1745_s16 = scalar_lea.vmem %s290_s14, %s1302_s10  ;;  %s1747_s17 = scalar_lea.vmem %s290_s14, %s1300_s7 }
  0x13   : > { %v1473_v0 = vld [vmem:[%s1745_s16] sm:$0xff]  ;;  %v1474_v1 = vld [vmem:[%s1745_s16 + $0x8] sm:$0xff]  ;;  %v1475_v2 = vld [vmem:[%s1745_s16 + $0x10] sm:$0xff]  ;;  %s1754_s20 = scalar_lea.vmem %s290_s14, %s1304_s18  ;;  %674 = vmatpush.bf16.msra.mxu0 %v1497_v7  ;;  %1542 = vmatpush.bf16.msra.mxu3 %v1497_v7  ;;  %s1292_s14 = sshll.u32 %s1651_s21, 4 }
  0x14   : > { %458 = vrot.lane.b32.xlu0 %v1473_v0, %s1669_s19  ;;  %460 = vrot.lane.b32.xlu1 %v1474_v1, %s1669_s19  ;;  %v1483_v3 = vld [vmem:[%s1754_s20] sm:$0xff]  ;;  %v1484_v4 = vld [vmem:[%s1754_s20 + $0x8] sm:$0xff]  ;;  %p294_p6 = scmp.lt.s32.totalorder %s1292_s14, 31 }
  0x15   : > { %462 = vrot.lane.b32.xlu2 %v1475_v2, %s1669_s19  ;;  %v1485_v5 = vld [vmem:[%s1754_s20 + $0x10] sm:$0xff]  ;;  %v1476_v8 = vld [vmem:[%s1745_s16 + $0x18] sm:$0xff]  ;;  %v1477_v14 = vld [vmem:[%s1745_s16 + $0x20] sm:$0xff] }
  0x16   : > { %v1486_v9 = vld [vmem:[%s1754_s20 + $0x18] sm:$0xff]  ;;  %v1479_v10 = vld [vmem:[%s1745_s16 + $0x30] sm:$0xff]  ;;  %v1487_v15 = vld [vmem:[%s1754_s20 + $0x20] sm:$0xff]  ;;  %s2137_s14 = smov (!%p294_p6, %s1292_s14), 31 }
  0x17   : > { %675 = vmatpush.bf16.msra.mxu0 %v1496_v11  ;;  %1543 = vmatpush.bf16.msra.mxu3 %v1496_v11  ;;  %v1489_v13 = vld [vmem:[%s1754_s20 + $0x30] sm:$0xff]  ;;  %v1480_v18 = vld [vmem:[%s1745_s16 + $0x38] sm:$0xff]  ;;  %v1478_v20 = vld [vmem:[%s1745_s16 + $0x28] sm:$0xff]  ;;  %s1964_s18 = sadd.s32 %s1293_s15, %s2137_s14 }
  0x18   : > { %v1490_v19 = vld [vmem:[%s1754_s20 + $0x38] sm:$0xff]  ;;  %v1488_v21 = vld [vmem:[%s1754_s20 + $0x28] sm:$0xff]  ;;  %v1463_v28 = vld [vmem:[%s1747_s17] sm:$0xff]  ;;  %s1294_s29 = sshll.u32 %s1964_s18, 2  ;;  %s1297_s22 = sshll.u32 %s1964_s18, 3 }
  0x19   : > { %v1464_v36 = vld [vmem:[%s1747_s17 + $0x8] sm:$0xff]  ;;  %v1469_v37 = vld [vmem:[%s1747_s17 + $0x30] sm:$0xff]  ;;  %v1470_v45 = vld [vmem:[%s1747_s17 + $0x38] sm:$0xff]  ;;  %s1970_s7 = scalar_lea.vmem %s2118_s1, %s1294_s29  ;;  %s1979_s9 = scalar_lea.vmem %s2123_s6, %s1297_s22 }
  0x1a   : > { %v1465_v47 = vld [vmem:[%s1747_s17 + $0x10] sm:$0xff]  ;;  %v1466_v53 = vld [vmem:[%s1747_s17 + $0x18] sm:$0xff]  ;;  %v1467_v56 = vld [vmem:[%s1747_s17 + $0x20] sm:$0xff] }
  0x1b   : > { %676 = vmatpush.bf16.msra.mxu0 %v1495_v12  ;;  %1544 = vmatpush.bf16.msra.mxu3 %v1495_v12  ;;  %v1468_v60 = vld [vmem:[%s1747_s17 + $0x28] sm:$0xff]  ;;  %v787_v2 = vld [vmem:[%s2121_s4] sm:$0xff] }
  0x1c   : > { %514 = vrot.lane.b32.xlu0 %v1483_v3, %s1670_s28  ;;  %516 = vrot.lane.b32.xlu1 %v1484_v4, %s1670_s28  ;;  %v788_v1 = vld [vmem:[%s2121_s4 + $0x8] sm:$0xff]  ;;  %v1851_v3 = vld [vmem:[%s2120_s3] ss:$0 sm:$0xff] }
  0x1d   : > { %518 = vrot.lane.b32.xlu2 %v1485_v5, %s1670_s28  ;;  %855 = vmatpush.msra.mxu2 %v788_v1 }
  0x1f   : > { %677 = vmatpush.bf16.msra.mxu0 %v1494_v16  ;;  %1545 = vmatpush.bf16.msra.mxu3 %v1494_v16 }
  0x20   : > { %856 = vmatpush.msra.mxu2 %v787_v2 }
  0x23   : > { %678 = vmatpush.bf16.msra.mxu0 %v1493_v17  ;;  %1546 = vmatpush.bf16.msra.mxu3 %v1493_v17 }
  0x24   : > { %464 = vrot.lane.b32.xlu0 %v1476_v8, %s1669_s19  ;;  %520 = vrot.lane.b32.xlu1 %v1486_v9, %s1670_s28 }
  0x25   : > { %470 = vrot.lane.b32.xlu2 %v1479_v10, %s1669_s19 }
  0x27   : > { %679 = vmatpush.bf16.msra.mxu0 %v1492_v22  ;;  %1547 = vmatpush.bf16.msra.mxu3 %v1492_v22 }
  0x2b   : > { %680 = vmatpush.bf16.msra.mxu0 %v1491_v24  ;;  %1548 = vmatpush.bf16.msra.mxu3 %v1491_v24 }
  0x2c   : > { %526 = vrot.lane.b32.xlu0 %v1489_v13, %s1670_s28  ;;  %466 = vrot.lane.b32.xlu1 %v1477_v14, %s1669_s19 }
  0x2d   : > { %522 = vrot.lane.b32.xlu2 %v1487_v15, %s1670_s28 }
  0x2f   : > { %1549 = vmatpush.bf16.msrb.mxu3 %v1499_v23 }
  0x34   : > { %472 = vrot.lane.b32.xlu0 %v1480_v18, %s1669_s19  ;;  %528 = vrot.lane.b32.xlu1 %v1490_v19, %s1670_s28 }
  0x35   : > { %468 = vrot.lane.b32.xlu2 %v1478_v20, %s1669_s19 }
  0x3c   : > { %524 = vrot.lane.b32.xlu0 %v1488_v21, %s1670_s28 }
  0x6f   : > { %v463_v25 = vpop.permute.xlu2 %462 }
  0x70   : > { %v539_v50 = vsel %vm530_vm0, %v1465_v47, %v463_v25 }
  0x77   : > { %v519_v33 = vpop.permute.xlu2 %518 }
  0x78   : > { %v563_v52 = vsel %vm555_vm2, %v539_v50, %v519_v33 }
  0x7f   : > { %v471_v38 = vpop.permute.xlu2 %470 }
  0x80   : > { %v551_v40 = vsel %vm530_vm0, %v1469_v37, %v471_v38 }
  0x86   : > { %v459_v26 = vpop.permute.xlu0 %458  ;;  %v461_v27 = vpop.permute.xlu1 %460 }
  0x87   : > { %v533_v29 = vsel %vm530_vm0, %v1463_v28, %v459_v26  ;;  %v536_v39 = vsel %vm530_vm0, %v1464_v36, %v461_v27  ;;  %v523_v58 = vpop.permute.xlu2 %522 }
  0x8e   : > { %v515_v30 = vpop.permute.xlu0 %514  ;;  %v517_v31 = vpop.permute.xlu1 %516 }
  0x8f   : > { %1437 = vmatmul.msk.bf16.vlgmr.msra.gmra.mxu1 %vm656_vm1, %v515_v30  ;;  %v557_v32 = vsel %vm555_vm2, %v533_v29, %v515_v30  ;;  %v560_v42 = vsel %vm555_vm2, %v536_v39, %v517_v31  ;;  %v469_v61 = vpop.permute.xlu2 %468 }
  0x90   : > { %681 = vmatmul.bf16.vlgmr.msra.gmra.mxu0 %v557_v32  ;;  %v548_v62 = vsel %vm530_vm0, %v1468_v60, %v469_v61 }
  0x96   : > { %v465_v34 = vpop.permute.xlu0 %464  ;;  %v521_v35 = vpop.permute.xlu1 %520 }
  0x97   : > { %v542_v54 = vsel %vm530_vm0, %v1466_v53, %v465_v34 }
  0x98   : > { %v566_v55 = vsel %vm555_vm2, %v542_v54, %v521_v35 }
  0x9e   : > { %v527_v41 = vpop.permute.xlu0 %526  ;;  %v467_v44 = vpop.permute.xlu1 %466 }
  0x9f   : > { %1438 = vmatmul.msk.bf16.gmra.mxu1 %vm656_vm1, %v517_v31  ;;  %v575_v43 = vsel %vm555_vm2, %v551_v40, %v527_v41  ;;  %v545_v57 = vsel %vm530_vm0, %v1467_v56, %v467_v44 }
  0xa0   : > { %686 = vmatmul.bf16.gmra.mxu0 %v560_v42  ;;  %711 = vmatmul.bf16.vlgmr.msra.gmra.mxu3 %v575_v43  ;;  %v569_v59 = vsel %vm555_vm2, %v545_v57, %v523_v58 }
  0xa1   : > { %1550 = vmatpush.msra.mxu3 %v788_v1 }
  0xa3   : > { %1551 = vmatpush.msra.mxu3 %v787_v2 }
  0xa6   : > { %v473_v46 = vpop.permute.xlu0 %472  ;;  %v529_v49 = vpop.permute.xlu1 %528 }
  0xa7   : > { %v554_v48 = vsel %vm530_vm0, %v1470_v45, %v473_v46 }
  0xa8   : > { %v578_v51 = vsel %vm555_vm2, %v554_v48, %v529_v49 }
  0xae   : > { %v525_v63 = vpop.permute.xlu0 %524 }
  0xaf   : > { %1439 = vmatmul.msk.bf16.gmra.mxu1 %vm656_vm1, %v519_v33  ;;  %v572_v0 = vsel %vm555_vm2, %v548_v62, %v525_v63 }
  0xb0   : > { %691 = vmatmul.bf16.gmra.mxu0 %v563_v52  ;;  %716 = vmatmul.bf16.gmra.mxu3 %v578_v51 }
  0xbf   : > { %1440 = vmatmul.msk.bf16.gmra.mxu1 %vm656_vm1, %v521_v35 }
  0xc0   : > { %696 = vmatmul.bf16.gmra.mxu0 %v566_v55  ;;  %1444 = vmatmul.msk.bf16.vlgmr.msrb.gmra.mxu3 %vm656_vm1, %v529_v49 }
  0xcf   : > { %1441 = vmatmul.msk.bf16.gmra.mxu1 %vm656_vm1, %v523_v58 }
  0xd0   : > { %701 = vmatmul.bf16.gmra.mxu0 %v569_v59 }
  0xdf   : > { %1442 = vmatmul.msk.bf16.gmra.mxu1 %vm656_vm1, %v525_v63 }
  0xe0   : > { %706 = vmatmul.bf16.gmra.mxu0 %v572_v0 }
  0xef   : > { %1443 = vmatmul.msk.bf16.gmra.mxu1 %vm656_vm1, %v527_v41 }
 0x10c   : > { %v731_v4 = vpop.f32.mrf.mxu1 }
 0x10d   : > { %v682_v5 = vpop.f32.mrf.mxu0 }
 0x10e   : > { %v683_v6 = vadd.f32 %v1851_v3, %v682_v5 }
 0x110   : > { %v1854_v7 = vadd.f32 %v731_v4, %v683_v6 }
 0x112   : > { %v771_v8 = vmul.f32 %v1854_v7, %v1854_v7 }
 0x114   : > { %v733_v9 = vpop.f32.mrf.mxu1  ;;  %1445 = vmatmul.msk.f32.vlgmr.msra.gmra.mxu2 %vm656_vm1, %v771_v8 }
 0x115   : > { %v684_v10 = vpop.f32.mrf.mxu0 }
 0x116   : > { %v685_v11 = vadd.f32 %v1851_v3, %v684_v10 }
 0x118   : > { %v1860_v12 = vadd.f32 %v733_v9, %v685_v11 }
 0x11a   : > { %v772_v13 = vmul.f32 %v1860_v12, %v1860_v12 }
 0x11c   : > { %v736_v14 = vpop.f32.mrf.mxu1  ;;  %1446 = vmatmul.msk.f32.gmra.mxu2 %vm656_vm1, %v772_v13 }
 0x11d   : > { %v687_v15 = vpop.f32.mrf.mxu0 }
 0x11e   : > { %v688_v16 = vadd.f32 %v1851_v3, %v687_v15 }
 0x120   : > { %v1866_v17 = vadd.f32 %v736_v14, %v688_v16 }
 0x122   : > { %v773_v18 = vmul.f32 %v1866_v17, %v1866_v17 }
 0x123   : > { %v1870_v19 = vpop.f32.mrf.mxu3 }
 0x124   : > { %v738_v20 = vpop.f32.mrf.mxu1  ;;  %1447 = vmatmul.msk.f32.gmra.mxu2 %vm656_vm1, %v773_v18  ;;  %v713_v15 = vadd.f32 %v1851_v3, %v1870_v19 }
 0x125   : > { %v689_v21 = vpop.f32.mrf.mxu0 }
 0x126   : > { %v690_v22 = vadd.f32 %v1851_v3, %v689_v21 }
 0x128   : > { %v1874_v23 = vadd.f32 %v738_v20, %v690_v22 }
 0x12a   : > { %v774_v24 = vmul.f32 %v1874_v23, %v1874_v23 }
 0x12b   : > { %v1878_v25 = vpop.f32.mrf.mxu3 }
 0x12c   : > { %v741_v26 = vpop.f32.mrf.mxu1  ;;  %1448 = vmatmul.msk.f32.gmra.mxu2 %vm656_vm1, %v774_v24  ;;  %v715_v21 = vadd.f32 %v1851_v3, %v1878_v25 }
 0x12d   : > { %v692_v27 = vpop.f32.mrf.mxu0 }
 0x12e   : > { %v693_v28 = vadd.f32 %v1851_v3, %v692_v27 }
 0x130   : > { %v1882_v29 = vadd.f32 %v741_v26, %v693_v28  ;;  %v1958_v26 = vld [vmem:[%s2122_s5] ss:$0 sm:$0xff] }
 0x132   : > { %v775_v30 = vmul.f32 %v1882_v29, %v1882_v29 }
 0x133   : > { %v717_v31 = vpop.f32.mrf.mxu3 }
 0x134   : > { %v743_v32 = vpop.f32.mrf.mxu1  ;;  %1449 = vmatmul.msk.f32.gmra.mxu2 %vm656_vm1, %v775_v30  ;;  %v718_v41 = vadd.f32 %v1851_v3, %v717_v31 }
 0x135   : > { %v694_v33 = vpop.f32.mrf.mxu0 }
 0x136   : > { %v695_v34 = vadd.f32 %v1851_v3, %v694_v33 }
 0x138   : > { %v1888_v35 = vadd.f32 %v743_v32, %v695_v34 }
 0x13a   : > { %v776_v36 = vmul.f32 %v1888_v35, %v1888_v35 }
 0x13b   : > { %v719_v37 = vpop.f32.mrf.mxu3 }
 0x13c   : > { %v746_v38 = vpop.f32.mrf.mxu1  ;;  %1450 = vmatmul.msk.f32.gmra.mxu2 %vm656_vm1, %v776_v36  ;;  %v720_v50 = vadd.f32 %v1851_v3, %v719_v37 }
 0x13d   : > { %v697_v39 = vpop.f32.mrf.mxu0 }
 0x13e   : > { %v698_v40 = vadd.f32 %v1851_v3, %v697_v39 }
 0x140   : > { %v1895_v42 = vadd.f32 %v746_v38, %v698_v40 }
 0x142   : > { %v777_v43 = vmul.f32 %v1895_v42, %v1895_v42 }
 0x143   : > { %v766_v44 = vpop.f32.mrf.mxu3 }
 0x144   : > { %v1899_v45 = vadd.f32 %v766_v44, %v718_v41  ;;  %v748_v46 = vpop.f32.mrf.mxu1  ;;  %1451 = vmatmul.msk.f32.gmra.mxu2 %vm656_vm1, %v777_v43  ;;  %v1501_v41 = vld [vmem:[%s1970_s7] sm:$0xff]  }
 0x145   : > { %v699_v47 = vpop.f32.mrf.mxu0 }
 0x146   : > { %v785_v48 = vmul.f32 %v1899_v45, %v1899_v45  ;;  %v700_v49 = vadd.f32 %v1851_v3, %v699_v47 }
 0x148   : > { %v1906_v51 = vadd.f32 %v748_v46, %v700_v49  ;;  %1459 = vmatmul.msk.f32.vlgmr.msra.gmra.mxu3 %vm656_vm1, %v785_v48  ;;  %v1502_v48 = vunpack.c.l.bf16 %v1501_v41 }
 0x14a   : > { %v778_v52 = vmul.f32 %v1906_v51, %v1906_v51 }
 0x14b   : > { %v768_v53 = vpop.f32.mrf.mxu3 }
 0x14c   : > { %v1911_v54 = vadd.f32 %v768_v53, %v720_v50  ;;  %v751_v55 = vpop.f32.mrf.mxu1  ;;  %1452 = vmatmul.msk.f32.gmra.mxu2 %vm656_vm1, %v778_v52 }
 0x14d   : > { %v702_v56 = vpop.f32.mrf.mxu0 }
 0x14e   : > { %v786_v57 = vmul.f32 %v1911_v54, %v1911_v54  ;;  %v703_v58 = vadd.f32 %v1851_v3, %v702_v56 }
 0x150   : > { %v1917_v59 = vadd.f32 %v751_v55, %v703_v58  ;;  %1460 = vmatmul.msk.f32.gmra.mxu3 %vm656_vm1, %v786_v57 }
 0x152   : > { %v779_v60 = vmul.f32 %v1917_v59, %v1917_v59 }
 0x154   : > { %v753_v61 = vpop.f32.mrf.mxu1  ;;  %1453 = vmatmul.msk.f32.gmra.mxu2 %vm656_vm1, %v779_v60 }
 0x155   : > { %v704_v62 = vpop.f32.mrf.mxu0 }
 0x156   : > { %v705_v63 = vadd.f32 %v1851_v3, %v704_v62 }
 0x158   : > { %v1924_v0 = vadd.f32 %v753_v61, %v705_v63 }
 0x15a   : > { %v780_v1 = vmul.f32 %v1924_v0, %v1924_v0 }
 0x15c   : > { %v756_v2 = vpop.f32.mrf.mxu1  ;;  %1454 = vmatmul.msk.f32.gmra.mxu2 %vm656_vm1, %v780_v1 }
 0x15d   : > { %v707_v4 = vpop.f32.mrf.mxu0 }
 0x15e   : > { %v708_v5 = vadd.f32 %v1851_v3, %v707_v4 }
 0x160   : > { %v1930_v6 = vadd.f32 %v756_v2, %v708_v5  ;;  %v1503_v2 = vunpack.c.h.bf16 %v1501_v41 }
 0x162   : > { %v781_v8 = vmul.f32 %v1930_v6, %v1930_v6 }
 0x164   : > { %v758_v9 = vpop.f32.mrf.mxu1  ;;  %1455 = vmatmul.msk.f32.gmra.mxu2 %vm656_vm1, %v781_v8 }
 0x165   : > { %v709_v10 = vpop.f32.mrf.mxu0 }
 0x166   : > { %v710_v11 = vadd.f32 %v1851_v3, %v709_v10 }
 0x168   : > { %v1936_v13 = vadd.f32 %v758_v9, %v710_v11 }
 0x16a   : > { %v782_v14 = vmul.f32 %v1936_v13, %v1936_v13 }
 0x16c   : > { %v761_v16 = vpop.f32.mrf.mxu1  ;;  %1456 = vmatmul.msk.f32.gmra.mxu2 %vm656_vm1, %v782_v14 }
 0x16d   : > { %v1943_v18 = vadd.f32 %v761_v16, %v713_v15 }
 0x16f   : > { %v783_v20 = vmul.f32 %v1943_v18, %v1943_v18 }
 0x174   : > { %v763_v22 = vpop.f32.mrf.mxu1  ;;  %1457 = vmatmul.msk.f32.gmra.mxu2 %vm656_vm1, %v783_v20 }
 0x175   : > { %v1950_v24 = vadd.f32 %v763_v22, %v715_v21  ;;  %v1534_v21 = vld [vmem:[%s1970_s7 + $0x8] sm:$0xff]  }
 0x177   : > { %v784_v19 = vmul.f32 %v1950_v24, %v1950_v24 }
 0x17c   : > { %1458 = vmatmul.msk.f32.gmra.mxu2 %vm656_vm1, %v784_v19 }
 0x197   : > { %v858_v27 = vpop.f32.mrf.mxu2 }
 0x198   : > { %v859_v28 = vadd.f32 %v1958_v26, %v858_v27 }
 0x19a   : > { %1597 = vrsqrt.f32 %v859_v28  ;;  %vm913_vm3 = vcmp.eq.f32.partialorder %v859_v28, inf  ;;  %v916_v46 = vand.u32 2147483648, %v859_v28  ;;  %vm915_vm4 = vcmp.eq.f32.partialorder %v859_v28, 0.0 }
 0x19f   : > { %v861_v3 = vpop.f32.mrf.mxu2 }
 0x1a0   : > { %v1598_v25 = vpop.eup %1597  ;;  %v862_v30 = vadd.f32 %v1958_v26, %v861_v3 }
 0x1a1   : > { %v907_v31 = vmul.f32 %v1598_v25, %v859_v28 }
 0x1a2   : > { %1599 = vrsqrt.f32 %v862_v30  ;;  %vm925_vm5 = vcmp.eq.f32.partialorder %v862_v30, inf  ;;  %vm927_vm6 = vcmp.eq.f32.partialorder %v862_v30, 0.0 }
 0x1a3   : > { %v908_v32 = vmul.f32 %v1598_v25, %v907_v31 }
 0x1a5   : > { %v909_v33 = vmul.f32 0.5, %v908_v32 }
 0x1a7   : > { %v910_v34 = vsub.f32 1.5, %v909_v33  ;;  %v864_v36 = vpop.f32.mrf.mxu2 }
 0x1a8   : > { %v1600_v37 = vpop.eup %1599  ;;  %v865_v38 = vadd.f32 %v1958_v26, %v864_v36 }
 0x1a9   : > { %v911_v39 = vmul.f32 %v1598_v25, %v910_v34  ;;  %v919_v40 = vmul.f32 %v1600_v37, %v862_v30 }
 0x1aa   : > { %1601 = vrsqrt.f32 %v865_v38  ;;  %vm937_vm7 = vcmp.eq.f32.partialorder %v865_v38, inf  ;;  %v940_v27 = vand.u32 2147483648, %v865_v38  ;;  %vm939_vm8 = vcmp.eq.f32.partialorder %v865_v38, 0.0 }
 0x1ab   : > { %v912_v43 = vmul.f32 %v911_v39, %v859_v28  ;;  %v920_v44 = vmul.f32 %v1600_v37, %v919_v40 }
 0x1ad   : > { %v914_v47 = vsel %vm913_vm3, %v859_v28, %v912_v43  ;;  %v921_v49 = vmul.f32 0.5, %v920_v44 }
 0x1ae   : > { %v917_v50 = vsel %vm915_vm4, %v916_v46, %v914_v47 }
 0x1af   : > { %v1098_v52 = vmul.f32 %v917_v50, %v1854_v7  ;;  %v922_v53 = vsub.f32 1.5, %v921_v49  ;;  %v867_v55 = vpop.f32.mrf.mxu2  ;;  %v928_v7 = vand.u32 2147483648, %v862_v30 }
 0x1b0   : > { %v1602_v56 = vpop.eup %1601  ;;  %v868_v57 = vadd.f32 %v1958_v26, %v867_v55 }
 0x1b1   : > { %v1146_v58 = vadd.f32 %v1502_v48, %v1098_v52  ;;  %v923_v60 = vmul.f32 %v1600_v37, %v922_v53  ;;  %v931_v61 = vmul.f32 %v1602_v56, %v865_v38 }
 0x1b2   : > { %1603 = vrsqrt.f32 %v868_v57  ;;  %vm949_vm9 = vcmp.eq.f32.partialorder %v868_v57, inf  ;;  %vm951_vm10 = vcmp.eq.f32.partialorder %v868_v57, 0.0 }
 0x1b3   : > { %1162 = vst.msk [vmem:[%s1979_s9] sm:$0xff] %vm656_vm1, %v1146_v58  ;;  %v924_v62 = vmul.f32 %v923_v60, %v862_v30  ;;  %v932_v63 = vmul.f32 %v1602_v56, %v931_v61  ;;  %v1535_v58 = vld [vmem:[%s1970_s7 + $0x10] sm:$0xff]  }
 0x1b5   : > { %v926_v1 = vsel %vm925_vm5, %v862_v30, %v924_v62  ;;  %v933_v4 = vmul.f32 0.5, %v932_v63 }
 0x1b6   : > { %v929_v5 = vsel %vm927_vm6, %v928_v7, %v926_v1  ;;  %v1510_v7 = vunpack.c.l.bf16 %v1535_v58 }
 0x1b7   : > { %v1099_v8 = vmul.f32 %v929_v5, %v1860_v12  ;;  %v934_v9 = vsub.f32 1.5, %v933_v4  ;;  %v870_v10 = vpop.f32.mrf.mxu2  ;;  %v1506_v12 = vunpack.c.l.bf16 %v1534_v21 }
 0x1b8   : > { %v1604_v11 = vpop.eup %1603  ;;  %v871_v14 = vadd.f32 %v1958_v26, %v870_v10 }
 0x1b9   : > { %v1147_v15 = vadd.f32 %v1503_v2, %v1099_v8  ;;  %v935_v16 = vmul.f32 %v1602_v56, %v934_v9  ;;  %v943_v20 = vmul.f32 %v1604_v11, %v868_v57 }
 0x1ba   : > { %1605 = vrsqrt.f32 %v871_v14  ;;  %vm961_vm11 = vcmp.eq.f32.partialorder %v871_v14, inf  ;;  %v964_v62 = vand.u32 2147483648, %v871_v14  ;;  %vm963_vm12 = vcmp.eq.f32.partialorder %v871_v14, 0.0 }
 0x1bb   : > { %1163 = vst.msk [vmem:[%s1979_s9 + $0x8] sm:$0xff] %vm656_vm1, %v1147_v15  ;;  %v936_v22 = vmul.f32 %v935_v16, %v865_v38  ;;  %v944_v19 = vmul.f32 %v1604_v11, %v943_v20 }
 0x1bd   : > { %v938_v28 = vsel %vm937_vm7, %v865_v38, %v936_v22  ;;  %v945_v3 = vmul.f32 0.5, %v944_v19  ;;  %v952_v38 = vand.u32 2147483648, %v868_v57  ;;  %v1511_v19 = vunpack.c.h.bf16 %v1535_v58 }
 0x1be   : > { %v941_v25 = vsel %vm939_vm8, %v940_v27, %v938_v28 }
 0x1bf   : > { %v1100_v30 = vmul.f32 %v941_v25, %v1866_v17  ;;  %v946_v31 = vsub.f32 1.5, %v945_v3  ;;  %v873_v32 = vpop.f32.mrf.mxu2  ;;  %v1507_v17 = vunpack.c.h.bf16 %v1534_v21 }
 0x1c0   : > { %v1606_v33 = vpop.eup %1605  ;;  %v874_v34 = vadd.f32 %v1958_v26, %v873_v32 }
 0x1c1   : > { %v1148_v36 = vadd.f32 %v1506_v12, %v1100_v30  ;;  %v947_v37 = vmul.f32 %v1604_v11, %v946_v31  ;;  %v955_v39 = vmul.f32 %v1606_v33, %v871_v14 }
 0x1c2   : > { %1607 = vrsqrt.f32 %v874_v34  ;;  %vm973_vm13 = vcmp.eq.f32.partialorder %v874_v34, inf  ;;  %vm975_vm14 = vcmp.eq.f32.partialorder %v874_v34, 0.0 }
 0x1c3   : > { %1164 = vst.msk [vmem:[%s1979_s9 + $0x10] sm:$0xff] %vm656_vm1, %v1148_v36  ;;  %v948_v40 = vmul.f32 %v947_v37, %v868_v57  ;;  %v956_v41 = vmul.f32 %v1606_v33, %v955_v39 }
 0x1c5   : > { %v950_v43 = vsel %vm949_vm9, %v868_v57, %v948_v40  ;;  %v957_v44 = vmul.f32 0.5, %v956_v41 }
 0x1c6   : > { %v953_v46 = vsel %vm951_vm10, %v952_v38, %v950_v43 }
 0x1c7   : > { %v1101_v47 = vmul.f32 %v953_v46, %v1874_v23  ;;  %v958_v48 = vsub.f32 1.5, %v957_v44  ;;  %v876_v49 = vpop.f32.mrf.mxu2 }
 0x1c8   : > { %v1608_v50 = vpop.eup %1607  ;;  %v1995_v52 = vadd.f32 %v1958_v26, %v876_v49 }
 0x1c9   : > { %v1149_v53 = vadd.f32 %v1507_v17, %v1101_v47  ;;  %v959_v55 = vmul.f32 %v1606_v33, %v958_v48  ;;  %v967_v56 = vmul.f32 %v1608_v50, %v874_v34 }
 0x1ca   : > { %1609 = vrsqrt.f32 %v1995_v52  ;;  %vm985_vm15 = vcmp.eq.f32.partialorder %v1995_v52, inf  ;;  %vm987_vm0 = vcmp.eq.f32.partialorder %v1995_v52, 0.0  ;;  %v988_v46 = vand.u32 2147483648, %v1995_v52 }
 0x1cb   : > { %1165 = vst.msk [vmem:[%s1979_s9 + $0x18] sm:$0xff] %vm656_vm1, %v1149_v53  ;;  %v960_v57 = vmul.f32 %v959_v55, %v871_v14  ;;  %v968_v60 = vmul.f32 %v1608_v50, %v967_v56  ;;  %v900_v61 = vpop.f32.mrf.mxu3 }
 0x1cc   : > { %v2002_v23 = vadd.f32 %v1958_v26, %v900_v61 }
 0x1cd   : > { %v962_v63 = vsel %vm961_vm11, %v871_v14, %v960_v57  ;;  %v969_v1 = vmul.f32 0.5, %v968_v60 }
 0x1ce   : > { %v965_v2 = vsel %vm963_vm12, %v964_v62, %v962_v63  ;;  %1611 = vrsqrt.f32 %v2002_v23  ;;  %vm1081_vm2 = vcmp.eq.f32.partialorder %v2002_v23, inf  ;;  %vm1083_vm3 = vcmp.eq.f32.partialorder %v2002_v23, 0.0 }
 0x1cf   : > { %v1102_v4 = vmul.f32 %v965_v2, %v1882_v29  ;;  %v970_v5 = vsub.f32 1.5, %v969_v1  ;;  %v879_v8 = vpop.f32.mrf.mxu2  ;;  %v976_v29 = vand.u32 2147483648, %v874_v34  ;;  %v1084_v58 = vand.u32 2147483648, %v2002_v23 }
 0x1d0   : > { %v1610_v9 = vpop.eup %1609  ;;  %v2007_v10 = vadd.f32 %v1958_v26, %v879_v8 }
 0x1d1   : > { %v1150_v11 = vadd.f32 %v1510_v7, %v1102_v4  ;;  %v971_v15 = vmul.f32 %v1608_v50, %v970_v5  ;;  %v979_v16 = vmul.f32 %v1610_v9, %v1995_v52  ;;  %v1540_v50 = vld [vmem:[%s1970_s7 + $0x38] sm:$0xff]  }
 0x1d2   : > { %1613 = vrsqrt.f32 %v2007_v10  ;;  %v1530_v7 = vunpack.c.l.bf16 %v1540_v50  ;;  %vm997_vm4 = vcmp.eq.f32.partialorder %v2007_v10, inf  ;;  %vm999_vm5 = vcmp.eq.f32.partialorder %v2007_v10, 0.0 }
 0x1d3   : > { %1166 = vst.msk [vmem:[%s1979_s9 + $0x20] sm:$0xff] %vm656_vm1, %v1150_v11  ;;  %v972_v14 = vmul.f32 %v971_v15, %v874_v34  ;;  %v980_v20 = vmul.f32 %v1610_v9, %v979_v16  ;;  %v903_v21 = vpop.f32.mrf.mxu3 }
 0x1d4   : > { %v1612_v22 = vpop.eup %1611  ;;  %v2014_v27 = vadd.f32 %v1958_v26, %v903_v21 }
 0x1d5   : > { %v974_v28 = vsel %vm973_vm13, %v874_v34, %v972_v14  ;;  %v981_v12 = vmul.f32 0.5, %v980_v20  ;;  %v1075_v3 = vmul.f32 %v1612_v22, %v2002_v23  ;;  %v1536_v34 = vld [vmem:[%s1970_s7 + $0x18] sm:$0xff]   ;;  %v1000_v14 = vand.u32 2147483648, %v2007_v10 }
 0x1d6   : > { %v977_v25 = vsel %vm975_vm14, %v976_v29, %v974_v28  ;;  %1615 = vrsqrt.f32 %v2014_v27  ;;  %v1514_v47 = vunpack.c.l.bf16 %v1536_v34  ;;  %vm1093_vm6 = vcmp.eq.f32.partialorder %v2014_v27, inf }
 0x1d7   : > { %v1103_v30 = vmul.f32 %v977_v25, %v1888_v35  ;;  %v982_v31 = vsub.f32 1.5, %v981_v12  ;;  %v1076_v32 = vmul.f32 %v1612_v22, %v1075_v3  ;;  %v882_v33 = vpop.f32.mrf.mxu2  ;;  %vm1095_vm7 = vcmp.eq.f32.partialorder %v2014_v27, 0.0 }
 0x1d8   : > { %v1614_v36 = vpop.eup %1613  ;;  %v2020_v37 = vadd.f32 %v1958_v26, %v882_v33 }
 0x1d9   : > { %v1151_v39 = vadd.f32 %v1511_v19, %v1103_v30  ;;  %v983_v40 = vmul.f32 %v1610_v9, %v982_v31  ;;  %v1077_v41 = vmul.f32 0.5, %v1076_v32  ;;  %v991_v38 = vmul.f32 %v1614_v36, %v2007_v10 }
 0x1da   : > { %1617 = vrsqrt.f32 %v2020_v37  ;;  %vm1009_vm8 = vcmp.eq.f32.partialorder %v2020_v37, inf  ;;  %vm1011_vm9 = vcmp.eq.f32.partialorder %v2020_v37, 0.0 }
 0x1db   : > { %1167 = vst.msk [vmem:[%s1979_s9 + $0x28] sm:$0xff] %vm656_vm1, %v1151_v39  ;;  %v984_v35 = vmul.f32 %v983_v40, %v1995_v52  ;;  %v1078_v43 = vsub.f32 1.5, %v1077_v41  ;;  %v992_v17 = vmul.f32 %v1614_v36, %v991_v38  ;;  %v1537_v41 = vld [vmem:[%s1970_s7 + $0x20] sm:$0xff]  }
 0x1dc   : > { %v1616_v44 = vpop.eup %1615 }
 0x1dd   : > { %v986_v48 = vsel %vm985_vm15, %v1995_v52, %v984_v35  ;;  %v1079_v49 = vmul.f32 %v1612_v22, %v1078_v43  ;;  %v993_v53 = vmul.f32 0.5, %v992_v17  ;;  %v1087_v55 = vmul.f32 %v1616_v44, %v2014_v27 }
 0x1de   : > { %v989_v56 = vsel %vm987_vm0, %v988_v46, %v986_v48  ;;  %v1518_v46 = vunpack.c.l.bf16 %v1537_v41 }
 0x1df   : > { %v1104_v57 = vmul.f32 %v989_v56, %v1895_v42  ;;  %v1080_v60 = vmul.f32 %v1079_v49, %v2002_v23  ;;  %v994_v61 = vsub.f32 1.5, %v993_v53  ;;  %v1088_v62 = vmul.f32 %v1616_v44, %v1087_v55  ;;  %v885_v52 = vpop.f32.mrf.mxu2 }
 0x1e0   : > { %v1618_v63 = vpop.eup %1617  ;;  %v2040_v1 = vadd.f32 %v1958_v26, %v885_v52 }
 0x1e1   : > { %v1152_v2 = vadd.f32 %v1514_v47, %v1104_v57  ;;  %v1082_v4 = vsel %vm1081_vm2, %v2002_v23, %v1080_v60  ;;  %v995_v5 = vmul.f32 %v1614_v36, %v994_v61  ;;  %v1089_v8 = vmul.f32 0.5, %v1088_v62 }
 0x1e2   : > { %v1085_v9 = vsel %vm1083_vm3, %v1084_v58, %v1082_v4  ;;  %v1003_v11 = vmul.f32 %v1618_v63, %v2020_v37  ;;  %1619 = vrsqrt.f32 %v2040_v1  ;;  %v1515_v23 = vunpack.c.h.bf16 %v1536_v34 }
 0x1e3   : > { %1168 = vst.msk [vmem:[%s1979_s9 + $0x30] sm:$0xff] %vm656_vm1, %v1152_v2  ;;  %v1112_v42 = vmul.f32 %v1085_v9, %v1899_v45  ;;  %v996_v15 = vmul.f32 %v995_v5, %v2007_v10  ;;  %v1090_v16 = vsub.f32 1.5, %v1089_v8  ;;  %v1096_v45 = vand.u32 2147483648, %v2014_v27 }
 0x1e4   : > { %v1004_v20 = vmul.f32 %v1618_v63, %v1003_v11  ;;  %v1531_v36 = vunpack.c.h.bf16 %v1540_v50  ;;  %vm1021_vm10 = vcmp.eq.f32.partialorder %v2040_v1, inf  ;;  %vm1023_vm11 = vcmp.eq.f32.partialorder %v2040_v1, 0.0 }
 0x1e5   : > { %v1160_v21 = vadd.f32 %v1530_v7, %v1112_v42  ;;  %v998_v22 = vsel %vm997_vm4, %v2007_v10, %v996_v15  ;;  %v1091_v29 = vmul.f32 %v1616_v44, %v1090_v16  ;;  %v1538_v42 = vld [vmem:[%s1970_s7 + $0x28] sm:$0xff]  }
 0x1e6   : > { %v1001_v19 = vsel %vm999_vm5, %v1000_v14, %v998_v22  ;;  %v1005_v28 = vmul.f32 0.5, %v1004_v20 }
 0x1e7   : > { %1176 = vst.msk [vmem:[%s1979_s9 + $0x70] sm:$0xff] %vm656_vm1, %v1160_v21  ;;  %v1105_v12 = vmul.f32 %v1001_v19, %v1906_v51  ;;  %v1092_v3 = vmul.f32 %v1091_v29, %v2014_v27  ;;  %v888_v25 = vpop.f32.mrf.mxu2 }
 0x1e8   : > { %v1620_v30 = vpop.eup %1619  ;;  %v1006_v10 = vsub.f32 1.5, %v1005_v28  ;;  %v889_v31 = vadd.f32 %v1958_v26, %v888_v25 }
 0x1e9   : > { %v1153_v32 = vadd.f32 %v1515_v23, %v1105_v12  ;;  %v1094_v33 = vsel %vm1093_vm6, %v2014_v27, %v1092_v3  ;;  %v1015_v39 = vmul.f32 %v1620_v30, %v2040_v1  ;;  %v1012_v27 = vand.u32 2147483648, %v2020_v37 }
 0x1ea   : > { %v1097_v40 = vsel %vm1095_vm7, %v1096_v45, %v1094_v33  ;;  %v1007_v34 = vmul.f32 %v1618_v63, %v1006_v10  ;;  %1621 = vrsqrt.f32 %v889_v31  ;;  %vm1033_vm12 = vcmp.eq.f32.partialorder %v889_v31, inf }
 0x1eb   : > { %1169 = vst.msk [vmem:[%s1979_s9 + $0x38] sm:$0xff] %vm656_vm1, %v1153_v32  ;;  %v1113_v51 = vmul.f32 %v1097_v40, %v1911_v54  ;;  %v1016_v38 = vmul.f32 %v1620_v30, %v1015_v39  ;;  %vm1035_vm13 = vcmp.eq.f32.partialorder %v889_v31, 0.0 }
 0x1ec   : > { %v1008_v35 = vmul.f32 %v1007_v34, %v2020_v37 }
 0x1ed   : > { %v1161_v43 = vadd.f32 %v1531_v36, %v1113_v51  ;;  %v1017_v17 = vmul.f32 0.5, %v1016_v38 }
 0x1ee   : > { %v1010_v44 = vsel %vm1009_vm8, %v2020_v37, %v1008_v35  ;;  %v1024_v37 = vand.u32 2147483648, %v2040_v1 }
 0x1ef   : > { %1177 = vst.msk [vmem:[%s1979_s9 + $0x78] sm:$0xff] %vm656_vm1, %v1161_v43  ;;  %v1013_v47 = vsel %vm1011_vm9, %v1012_v27, %v1010_v44  ;;  %v1018_v54 = vsub.f32 1.5, %v1017_v17  ;;  %v891_v48 = vpop.f32.mrf.mxu2 }
 0x1f0   : > { %v1622_v49 = vpop.eup %1621  ;;  %v1106_v50 = vmul.f32 %v1013_v47, %v1917_v59  ;;  %v892_v53 = vadd.f32 %v1958_v26, %v891_v48  ;;  %v1519_v59 = vunpack.c.h.bf16 %v1537_v41  ;;  %v1539_v41 = vld [vmem:[%s1970_s7 + $0x30] sm:$0xff]  }
 0x1f1   : > { %v1019_v55 = vmul.f32 %v1620_v30, %v1018_v54  ;;  %v1027_v56 = vmul.f32 %v1622_v49, %v889_v31  ;;  %v1526_v17 = vunpack.c.l.bf16 %v1539_v41 }
 0x1f2   : > { %v1154_v58 = vadd.f32 %v1518_v46, %v1106_v50  ;;  %1623 = vrsqrt.f32 %v892_v53  ;;  %vm1045_vm14 = vcmp.eq.f32.partialorder %v892_v53, inf  ;;  %v1048_v10 = vand.u32 2147483648, %v892_v53 }
 0x1f3   : > { %v1020_v57 = vmul.f32 %v1019_v55, %v2040_v1  ;;  %v1028_v60 = vmul.f32 %v1622_v49, %v1027_v56  ;;  %vm1047_vm15 = vcmp.eq.f32.partialorder %v892_v53, 0.0  ;;  %v1527_v55 = vunpack.c.h.bf16 %v1539_v41 }
 0x1f4   : > { %1170 = vst.msk [vmem:[%s1979_s9 + $0x40] sm:$0xff] %vm656_vm1, %v1154_v58 }
 0x1f5   : > { %v1022_v61 = vsel %vm1021_vm10, %v2040_v1, %v1020_v57  ;;  %v1029_v62 = vmul.f32 0.5, %v1028_v60  ;;  %v1036_v1 = vand.u32 2147483648, %v889_v31 }
 0x1f6   : > { %v1025_v52 = vsel %vm1023_vm11, %v1024_v37, %v1022_v61 }
 0x1f7   : > { %v1107_v63 = vmul.f32 %v1025_v52, %v1924_v0  ;;  %v1030_v7 = vsub.f32 1.5, %v1029_v62  ;;  %v894_v2 = vpop.f32.mrf.mxu2  ;;  %v1522_v0 = vunpack.c.l.bf16 %v1538_v42 }
 0x1f8   : > { %v1624_v4 = vpop.eup %1623  ;;  %v895_v5 = vadd.f32 %v1958_v26, %v894_v2 }
 0x1f9   : > { %v1155_v8 = vadd.f32 %v1519_v59, %v1107_v63  ;;  %v1031_v9 = vmul.f32 %v1622_v49, %v1030_v7  ;;  %v1039_v11 = vmul.f32 %v1624_v4, %v892_v53 }
 0x1fa   : > { %1625 = vrsqrt.f32 %v895_v5  ;;  %vm1057_vm0 = vcmp.eq.f32.partialorder %v895_v5, inf  ;;  %v1060_v43 = vand.u32 2147483648, %v895_v5  ;;  %vm1059_vm2 = vcmp.eq.f32.partialorder %v895_v5, 0.0 }
 0x1fb   : > { %1171 = vst.msk [vmem:[%s1979_s9 + $0x48] sm:$0xff] %vm656_vm1, %v1155_v8  ;;  %v1032_v15 = vmul.f32 %v1031_v9, %v889_v31  ;;  %v1040_v16 = vmul.f32 %v1624_v4, %v1039_v11 }
 0x1fd   : > { %v1034_v14 = vsel %vm1033_vm12, %v889_v31, %v1032_v15  ;;  %v1041_v23 = vmul.f32 0.5, %v1040_v16 }
 0x1fe   : > { %v1037_v20 = vsel %vm1035_vm13, %v1036_v1, %v1034_v14 }
 0x1ff   : > { %v1108_v21 = vmul.f32 %v1037_v20, %v1930_v6  ;;  %v1042_v22 = vsub.f32 1.5, %v1041_v23  ;;  %v897_v29 = vpop.f32.mrf.mxu2  ;;  %v1523_v6 = vunpack.c.h.bf16 %v1538_v42 }
 0x200   : > { %v1626_v19 = vpop.eup %1625  ;;  %v898_v45 = vadd.f32 %v1958_v26, %v897_v29 }
 0x201   : > { %v1156_v28 = vadd.f32 %v1522_v0, %v1108_v21  ;;  %v1043_v12 = vmul.f32 %v1624_v4, %v1042_v22  ;;  %v1051_v3 = vmul.f32 %v1626_v19, %v895_v5 }
 0x202   : > { %1627 = vrsqrt.f32 %v898_v45  ;;  %vm1069_vm3 = vcmp.eq.f32.partialorder %v898_v45, inf  ;;  %v1072_v50 = vand.u32 2147483648, %v898_v45  ;;  %vm1071_vm4 = vcmp.eq.f32.partialorder %v898_v45, 0.0 }
 0x203   : > { %1172 = vst.msk [vmem:[%s1979_s9 + $0x50] sm:$0xff] %vm656_vm1, %v1156_v28  ;;  %v1044_v25 = vmul.f32 %v1043_v12, %v892_v53  ;;  %v1052_v30 = vmul.f32 %v1626_v19, %v1051_v3 }
 0x205   : > { %v1046_v31 = vsel %vm1045_vm14, %v892_v53, %v1044_v25  ;;  %v1053_v32 = vmul.f32 0.5, %v1052_v30 }
 0x206   : > { %v1049_v33 = vsel %vm1047_vm15, %v1048_v10, %v1046_v31 }
 0x207   : > { %v1109_v36 = vmul.f32 %v1049_v33, %v1936_v13  ;;  %v1054_v26 = vsub.f32 1.5, %v1053_v32 }
 0x208   : > { %v1628_v39 = vpop.eup %1627 }
 0x209   : > { %v1157_v40 = vadd.f32 %v1523_v6, %v1109_v36  ;;  %v1055_v34 = vmul.f32 %v1626_v19, %v1054_v26  ;;  %v1063_v51 = vmul.f32 %v1628_v39, %v898_v45 }
 0x20b   : > { %1173 = vst.msk [vmem:[%s1979_s9 + $0x58] sm:$0xff] %vm656_vm1, %v1157_v40  ;;  %v1056_v38 = vmul.f32 %v1055_v34, %v895_v5  ;;  %v1064_v35 = vmul.f32 %v1628_v39, %v1063_v51 }
 0x20d   : > { %v1058_v27 = vsel %vm1057_vm0, %v895_v5, %v1056_v38  ;;  %v1065_v44 = vmul.f32 0.5, %v1064_v35 }
 0x20e   : > { %v1061_v46 = vsel %vm1059_vm2, %v1060_v43, %v1058_v27 }
 0x20f   : > { %v1110_v13 = vmul.f32 %v1061_v46, %v1943_v18  ;;  %v1066_v47 = vsub.f32 1.5, %v1065_v44 }
 0x211   : > { %v1158_v54 = vadd.f32 %v1526_v17, %v1110_v13  ;;  %v1067_v48 = vmul.f32 %v1628_v39, %v1066_v47 }
 0x213   : > { %1174 = vst.msk [vmem:[%s1979_s9 + $0x60] sm:$0xff] %vm656_vm1, %v1158_v54  ;;  %v1068_v49 = vmul.f32 %v1067_v48, %v898_v45 }
 0x215   : > { %v1070_v53 = vsel %vm1069_vm3, %v898_v45, %v1068_v49 }
 0x216   : > { %v1073_v56 = vsel %vm1071_vm4, %v1072_v50, %v1070_v53 }
 0x217   : > { %v1111_v58 = vmul.f32 %v1073_v56, %v1950_v24 }
 0x219   : > { %v1159_v57 = vadd.f32 %v1527_v55, %v1111_v58 }
 0x21b   : > { %1175 = vst.msk [vmem:[%s1979_s9 + $0x68] sm:$0xff] %vm656_vm1, %v1159_v57 }
 0x21c PF: > { %s16_s25 = sadd.s32 1, %s1667_s25   ;;  %s2124_s21 = smov %s1659_s23 }
 0x21d   : > { %p13_p7 = scmp.ge.s32.totalorder %s16_s25, 6   ;;  %s2125_s22 = smov %s1663_s24 }
 0x21e   : > { %s2126_s23 = smov %s2129_s26  ;;  %s2127_s24 = smov %s2133_s27 }
 0x21f   :  { %15 = sbr.rel (!%p13_p7) target bundleno = 3 (0x3), region = 80 }

</bundles_post_ra>
